<compile_context>
chip_gen: v7x
topology: tpu7x:2x2x1
jax: 0.10.0
libtpu: 0.0.40
codegen_flags: <defaults>
</compile_context>

<pallas_src>
import functools

import jax
import jax.numpy as jnp
from jax.experimental import pallas as pl
from jax.experimental.pallas import tpu as pltpu

_LANE = 128


def _round_up(n: int, m: int) -> int:
    return ((n + m - 1) // m) * m


# --------------------------------------------------------------------------- #
# Kernel
# --------------------------------------------------------------------------- #
def _lstma_kernel(s_ref, c_ref, wg_ref, bg_ref, why_ref, bhy_ref,
                  y_ref, newh_ref, newc_ref, *, h_pad):
    # One fused gate matmul on the MXU: [TB, K_pad] @ [K_pad, 4*H_pad], f32 acc.
    pre = (jnp.dot(s_ref[...], wg_ref[...], preferred_element_type=jnp.float32)
           + bg_ref[...])                                 # biases kept in f32

    # Lane-aligned static slices (H_pad is a multiple of 128).
    i_gate = jax.nn.sigmoid(pre[:, 0 * h_pad:1 * h_pad])  # + i_bias (0.0)
    f_gate = jax.nn.sigmoid(pre[:, 1 * h_pad:2 * h_pad])  # + f_bias (0.0)
    o_gate = jax.nn.sigmoid(pre[:, 2 * h_pad:3 * h_pad])  # + o_bias (0.0)
    update = jnp.tanh(pre[:, 3 * h_pad:4 * h_pad])        # f_su = tanh

    c = c_ref[...]                                        # already f32
    new_c = f_gate * c + i_gate * update
    t = jnp.tanh(new_c)          # computed once, reused twice (single EUP stream)
    new_h = o_gate * t           # f_ch = tanh
    # LSTMA's extra squash: new_c_out = f_s(new_c) = tanh(new_c) == t

    # Output head + log-softmax (f_hy = logsoftmax, dim=-1).
    # Padded lanes of b_hy are pre-filled with -1e30 in the wrapper, so they
    # drop out of the normalization without any in-kernel masking.
    logits = (jnp.dot(new_h.astype(why_ref.dtype), why_ref[...],
                      preferred_element_type=jnp.float32)
              + bhy_ref[...])

    m = jnp.max(logits, axis=-1, keepdims=True)
    lse = jnp.log(jnp.sum(jnp.exp(logits - m), axis=-1, keepdims=True)) + m

    # NOTE: on v5e these three stores could be emitted as bf16 to halve
    # writeback traffic; kept f32 here for state-carry precision.
    y_ref[...] = (logits - lse).astype(y_ref.dtype)
    newh_ref[...] = new_h.astype(newh_ref.dtype)
    newc_ref[...] = t.astype(newc_ref.dtype)


# --------------------------------------------------------------------------- #
# One-time parameter preparation (fuse + pad + cast) — call once, reuse per step.
# --------------------------------------------------------------------------- #
def prepare_params(params, compute_dtype=jnp.bfloat16):
    x_plus_h, h_size = params["w_si"].shape
    y_size = params["w_hy"].shape[-1]

    h_pad = _round_up(h_size, _LANE)
    y_pad = _round_up(y_size, _LANE)
    k_pad = _round_up(x_plus_h, 2 * _LANE)   # 256: native MXU K-edge on v6e/v7x

    def pad_w(w):      # [K, H] -> [K_pad, H_pad], zero padding
        return jnp.pad(w, ((0, k_pad - x_plus_h), (0, h_pad - h_size)))

    def pad_b(b):      # [1, H] -> [1, H_pad], zero padding
        return jnp.pad(b, ((0, 0), (0, h_pad - h_size)))

    # Fused gate slab (order: i | f | o | u), each gate lane-padded to 128.
    w_gates = jnp.concatenate(
        [pad_w(params["w_si"]), pad_w(params["w_sf"]),
         pad_w(params["w_so"]), pad_w(params["w_ci"])],
        axis=-1).astype(compute_dtype)
    b_gates = jnp.concatenate(
        [pad_b(params["b_si"]), pad_b(params["b_sf"]),
         pad_b(params["b_so"]), pad_b(params["b_ci"])],
        axis=-1).astype(jnp.float32)                      # biases stay f32

    w_hy = jnp.pad(params["w_hy"],
                   ((0, h_pad - h_size), (0, y_pad - y_size))
                   ).astype(compute_dtype)
    # Padded head-bias lanes get -1e30 so padded logits vanish from the softmax.
    b_hy = jnp.pad(params["b_hy"].astype(jnp.float32),
                   ((0, 0), (0, y_pad - y_size)),
                   constant_values=-1e30)

    return {
        "w_gates": w_gates, "b_gates": b_gates, "w_hy": w_hy, "b_hy": b_hy,
        "x_plus_h": x_plus_h, "h_size": h_size, "y_size": y_size,
        "h_pad": h_pad, "y_pad": y_pad, "k_pad": k_pad,
        "compute_dtype": compute_dtype,
    }


# --------------------------------------------------------------------------- #
# VMEM budgeting helpers
# --------------------------------------------------------------------------- #
def _vmem_limit_bytes() -> int:
    try:
        cap = int(pltpu.get_tpu_info().vmem_capacity_bytes)
    except Exception:                      # conservative fallback (v7x-sized)
        cap = 64 * 1024 * 1024
    # Up to ~100 MiB on 128-MiB chips (v5e/v6e), ~85% of 64 MiB on v7x.
    return min(int(cap * 0.85), 100 * 1024 * 1024)


def _fit_batch_tile(tb, k_pad, h_pad, y_pad, vmem_limit) -> int:
    """Shrink the batch tile until the rough VMEM footprint fits."""
    budget = int(vmem_limit * 0.8)
    # Resident constants (assume double-buffered worst case) — bf16 weights + f32 biases.
    const_bytes = (2 * 2 * (k_pad * 4 * h_pad + h_pad * y_pad)
                   + 2 * 4 * (4 * h_pad + y_pad))
    while True:
        per_tile = (2 * tb * k_pad * 2                 # s (bf16, double-buffered)
                    + 2 * tb * h_pad * 4               # c (f32, double-buffered)
                    + 2 * tb * (y_pad + 2 * h_pad) * 4 # y / new_h / new_c outputs
                    + tb * 4 * h_pad * 4)              # f32 `pre` intermediate
        if const_bytes + per_tile <= budget or tb <= 8:
            return tb
        tb = max(8, _round_up(tb // 2, 8))


# --------------------------------------------------------------------------- #
# pallas_call builder + wrapper
# --------------------------------------------------------------------------- #
def _call_kernel(s, c_in, prep, tb, b_pad, vmem_limit, single_buffer_consts):
    k_pad, h_pad, y_pad = prep["k_pad"], prep["h_pad"], prep["y_pad"]

    const_kwargs = ({"pipeline_mode": pl.Buffered(1)}
                    if single_buffer_consts else {})

    def batch_spec(feat):
        return pl.BlockSpec((tb, feat), lambda i: (i, 0))

    def const_spec(shape):
        return pl.BlockSpec(shape, lambda i: (0, 0), **const_kwargs)

    in_specs = [
        batch_spec(k_pad),                # s = concat(x, h), zero-padded to K_pad
        batch_spec(h_pad),                # c (f32)
        const_spec((k_pad, 4 * h_pad)),   # fused gate weights (bf16)
        const_spec((1, 4 * h_pad)),       # fused gate biases (f32)
        const_spec((h_pad, y_pad)),       # output head weight (bf16)
        const_spec((1, y_pad)),           # output head bias (f32, -1e30 padding)
    ]
    out_specs = (batch_spec(y_pad), batch_spec(h_pad), batch_spec(h_pad))
    out_shape = (
        jax.ShapeDtypeStruct((b_pad, y_pad), jnp.float32),
        jax.ShapeDtypeStruct((b_pad, h_pad), jnp.float32),
        jax.ShapeDtypeStruct((b_pad, h_pad), jnp.float32),
    )

    kernel = functools.partial(_lstma_kernel, h_pad=h_pad)

    return pl.pallas_call(
        kernel,
        grid_spec=pltpu.PrefetchScalarGridSpec(
            num_scalar_prefetch=0,
            grid=(b_pad // tb,),
            in_specs=in_specs,
            out_specs=out_specs,
        ),
        out_shape=out_shape,
        input_output_aliases={1: 2},   # reuse the fresh padded c buffer for new_c
        compiler_params=pltpu.CompilerParams(
            dimension_semantics=("parallel",),
            vmem_limit_bytes=vmem_limit),
    )(s, c_in, prep["w_gates"], prep["b_gates"], prep["w_hy"], prep["b_hy"])


def lstma_forward(x, h, c, prep):
    """Runs one LSTMA cell step with pre-fused params. Returns (y, (new_h, new_c))."""
    B, x_size = x.shape
    h_size = prep["h_size"]
    assert x_size + h_size == prep["x_plus_h"]

    cdt = prep["compute_dtype"]
    k_pad, h_pad = prep["k_pad"], prep["h_pad"]

    vmem_limit = _vmem_limit_bytes()

    # Batch tiling: >= 2 tiles when B > 8 (spans both v7x cores, overlaps DMA),
    # default max tile 256, shrunk further if the VMEM estimate doesn't fit.
    if B <= 8:
        tb = 8
    else:
        tb = min(256, _round_up((B + 1) // 2, 8))
    tb = _fit_batch_tile(tb, k_pad, h_pad, prep["y_pad"], vmem_limit)
    b_pad = _round_up(B, tb)

    # concat(x, h) once, cast to bf16, zero-padded to [b_pad, k_pad].
    s = jnp.zeros((b_pad, k_pad), cdt)
    s = s.at[:B, :x_size].set(x.astype(cdt))
    s = s.at[:B, x_size:x_size + h_size].set(h.astype(cdt))

    # Fresh, lane-padded f32 cell-state buffer (fresh copy -> aliasing is safe).
    c_in = jnp.zeros((b_pad, h_pad), jnp.float32).at[:B, :h_size].set(
        c.astype(jnp.float32))

    try:
        y, new_h, new_c = _call_kernel(s, c_in, prep, tb, b_pad, vmem_limit,
                                       single_buffer_consts=True)
    except Exception:
        # Fallback if this JAX build rejects pl.Buffered(1) for constant blocks.
        y, new_h, new_c = _call_kernel(s, c_in, prep, tb, b_pad, vmem_limit,
                                       single_buffer_consts=False)

    # Slice off lane/batch padding.
    return y[:B, :prep["y_size"]], (new_h[:B, :h_size], new_c[:B, :h_size])


# --------------------------------------------------------------------------- #
# Init + pure-JAX reference
# --------------------------------------------------------------------------- #
def init_params(key, x_size, h_size, y_size):
    """Deterministic init mimicking torch.nn.Linear (uniform +-1/sqrt(fan_in))."""
    keys = jax.random.split(key, 10)
    s_in = x_size + h_size
    bound_s = 1.0 / jnp.sqrt(s_in)
    bound_y = 1.0 / jnp.sqrt(h_size)

    def u(k, shape, bound):
        return jax.random.uniform(k, shape, jnp.float32, -bound, bound)

    return {
        "w_si": u(keys[0], (s_in, h_size), bound_s),
        "w_sf": u(keys[1], (s_in, h_size), bound_s),
        "w_so": u(keys[2], (s_in, h_size), bound_s),
        "w_ci": u(keys[3], (s_in, h_size), bound_s),
        "b_si": u(keys[4], (1, h_size), bound_s),
        "b_sf": u(keys[5], (1, h_size), bound_s),
        "b_so": u(keys[6], (1, h_size), bound_s),
        "b_ci": u(keys[7], (1, h_size), bound_s),
        "w_hy": u(keys[8], (h_size, y_size), bound_y),
        "b_hy": u(keys[9], (1, y_size), bound_y),
    }


def lstma_reference(x, h, c, params):
    """Pure-JAX f32 reference for validation."""
    s = jnp.concatenate((x, h), axis=-1)
    i = jax.nn.sigmoid(s @ params["w_si"] + params["b_si"])
    f = jax.nn.sigmoid(s @ params["w_sf"] + params["b_sf"])
    o = jax.nn.sigmoid(s @ params["w_so"] + params["b_so"])
    u = jnp.tanh(s @ params["w_ci"] + params["b_ci"])
    new_c = f * c + i * u
    new_h = o * jnp.tanh(new_c)
    new_c = jnp.tanh(new_c)
    y = jax.nn.log_softmax(new_h @ params["w_hy"] + params["b_hy"], axis=-1)
    return y, (new_h, new_c)


if __name__ == "__main__":
    B, X, H, Y = 2, 4, 32, 16

    key = jax.random.PRNGKey(0)
    k_param, k_x, k_h, k_c = jax.random.split(key, 4)

    params = init_params(k_param, X, H, Y)
    prep = prepare_params(params)          # one-time weight fusion / pad / bf16 cast

    x = jax.random.normal(k_x, (B, X), jnp.float32)
    h0 = jax.random.normal(k_h, (B, H), jnp.float32) * 0.1
    c0 = jax.random.normal(k_c, (B, H), jnp.float32) * 0.1

    y, (new_h, new_c) = lstma_forward(x, h0, c0, prep)
    jax.block_until_ready((y, new_h, new_c))

    y_ref, (h_ref, c_ref) = lstma_reference(x, h0, c0, params)
    # bf16 MXU operands -> compare against the f32 reference at bf16 tolerance.
    assert jnp.allclose(y, y_ref, atol=2e-2, rtol=2e-2), "y mismatch"
    assert jnp.allclose(new_h, h_ref, atol=2e-2, rtol=2e-2), "h mismatch"
    assert jnp.allclose(new_c, c_ref, atol=2e-2, rtol=2e-2), "c mismatch"

    print("KERNEL_OK")
</pallas_src>

<mosaic_0001>
module attributes {stable_mosaic.version = 11 : i64} {
  func.func @_lstma_kernel(%arg0: i32, %arg1: memref<8x256xbf16, #tpu.memory_space<vmem>>, %arg2: memref<8x128xf32, #tpu.memory_space<vmem>>, %arg3: memref<256x512xbf16, #tpu.memory_space<vmem>>, %arg4: memref<1x512xf32, #tpu.memory_space<vmem>>, %arg5: memref<128x128xbf16, #tpu.memory_space<vmem>>, %arg6: memref<1x128xf32, #tpu.memory_space<vmem>>, %arg7: memref<8x128xf32, #tpu.memory_space<vmem>>, %arg8: memref<8x128xf32, #tpu.memory_space<vmem>>, %arg9: memref<8x128xf32, #tpu.memory_space<vmem>>) attributes {dimension_semantics = [#tpu.dimension_semantics<parallel>], iteration_bounds = array<i64: 1>, scalar_prefetch = 0 : i64, scratch_operands = 0 : i64, tpu.core_type = #tpu.core_type<tc>, window_params = [{transform_indices = @transform_0, window_bounds = array<i64: 8, 256>}, {transform_indices = @transform_1, window_bounds = array<i64: 8, 128>}, {pipeline_mode = #tpu.pipeline_mode<synchronous>, transform_indices = @transform_2, window_bounds = array<i64: 256, 512>}, {pipeline_mode = #tpu.pipeline_mode<synchronous>, transform_indices = @transform_3, window_bounds = array<i64: 1, 512>}, {pipeline_mode = #tpu.pipeline_mode<synchronous>, transform_indices = @transform_4, window_bounds = array<i64: 128, 128>}, {pipeline_mode = #tpu.pipeline_mode<synchronous>, transform_indices = @transform_5, window_bounds = array<i64: 1, 128>}, {transform_indices = @transform_6, window_bounds = array<i64: 8, 128>}, {transform_indices = @transform_7, window_bounds = array<i64: 8, 128>}, {transform_indices = @transform_8, window_bounds = array<i64: 8, 128>}]} {
    %c0 = arith.constant 0 : index
    %c0_0 = arith.constant 0 : index
    %0 = vector.load %arg1[%c0, %c0_0] : memref<8x256xbf16, #tpu.memory_space<vmem>>, vector<8x256xbf16>
    %c0_1 = arith.constant 0 : index
    %c0_2 = arith.constant 0 : index
    %1 = vector.load %arg3[%c0_1, %c0_2] : memref<256x512xbf16, #tpu.memory_space<vmem>>, vector<256x512xbf16>
    %cst = arith.constant dense<0.000000e+00> : vector<8x512xf32>
    %2 = tpu.matmul %0, %1, %cst {dimension_numbers = #tpu.dot_dimension_numbers<[1], [0], [0], [1], [0, 0, 1, 1], [], []>} : vector<8x256xbf16>, vector<256x512xbf16>, vector<8x512xf32> -> vector<8x512xf32>
    %c0_3 = arith.constant 0 : index
    %c0_4 = arith.constant 0 : index
    %3 = vector.load %arg4[%c0_3, %c0_4] : memref<1x512xf32, #tpu.memory_space<vmem>>, vector<1x512xf32>
    %4 = vector.broadcast %3 : vector<1x512xf32> to vector<8x512xf32>
    %5 = arith.addf %2, %4 : vector<8x512xf32>
    %6 = vector.extract_strided_slice %5 {offsets = [0, 0], sizes = [8, 128], strides = [1, 1]} : vector<8x512xf32> to vector<8x128xf32>
    %7 = arith.negf %6 : vector<8x128xf32>
    %8 = math.exp %7 : vector<8x128xf32>
    %cst_5 = arith.constant 1.000000e+00 : f32
    %9 = vector.broadcast %cst_5 : f32 to vector<8x128xf32>
    %10 = arith.addf %9, %8 : vector<8x128xf32>
    %11 = arith.divf %9, %10 : vector<8x128xf32>
    %12 = vector.extract_strided_slice %5 {offsets = [0, 128], sizes = [8, 128], strides = [1, 1]} : vector<8x512xf32> to vector<8x128xf32>
    %13 = arith.negf %12 : vector<8x128xf32>
    %14 = math.exp %13 : vector<8x128xf32>
    %cst_6 = arith.constant 1.000000e+00 : f32
    %15 = vector.broadcast %cst_6 : f32 to vector<8x128xf32>
    %16 = arith.addf %15, %14 : vector<8x128xf32>
    %17 = arith.divf %15, %16 : vector<8x128xf32>
    %18 = vector.extract_strided_slice %5 {offsets = [0, 256], sizes = [8, 128], strides = [1, 1]} : vector<8x512xf32> to vector<8x128xf32>
    %19 = arith.negf %18 : vector<8x128xf32>
    %20 = math.exp %19 : vector<8x128xf32>
    %cst_7 = arith.constant 1.000000e+00 : f32
    %21 = vector.broadcast %cst_7 : f32 to vector<8x128xf32>
    %22 = arith.addf %21, %20 : vector<8x128xf32>
    %23 = arith.divf %21, %22 : vector<8x128xf32>
    %24 = vector.extract_strided_slice %5 {offsets = [0, 384], sizes = [8, 128], strides = [1, 1]} : vector<8x512xf32> to vector<8x128xf32>
    %25 = math.tanh %24 : vector<8x128xf32>
    %c0_8 = arith.constant 0 : index
    %c0_9 = arith.constant 0 : index
    %26 = vector.load %arg2[%c0_8, %c0_9] : memref<8x128xf32, #tpu.memory_space<vmem>>, vector<8x128xf32>
    %27 = arith.mulf %17, %26 : vector<8x128xf32>
    %28 = arith.mulf %11, %25 : vector<8x128xf32>
    %29 = arith.addf %27, %28 : vector<8x128xf32>
    %30 = math.tanh %29 : vector<8x128xf32>
    %31 = arith.mulf %23, %30 : vector<8x128xf32>
    %32 = arith.truncf %31 : vector<8x128xf32> to vector<8x128xbf16>
    %c0_10 = arith.constant 0 : index
    %c0_11 = arith.constant 0 : index
    %33 = vector.load %arg5[%c0_10, %c0_11] : memref<128x128xbf16, #tpu.memory_space<vmem>>, vector<128x128xbf16>
    %cst_12 = arith.constant dense<0.000000e+00> : vector<8x128xf32>
    %34 = tpu.matmul %32, %33, %cst_12 {dimension_numbers = #tpu.dot_dimension_numbers<[1], [0], [0], [1], [0, 0, 1, 1], [], []>} : vector<8x128xbf16>, vector<128x128xbf16>, vector<8x128xf32> -> vector<8x128xf32>
    %c0_13 = arith.constant 0 : index
    %c0_14 = arith.constant 0 : index
    %35 = vector.load %arg6[%c0_13, %c0_14] : memref<1x128xf32, #tpu.memory_space<vmem>>, vector<1x128xf32>
    %36 = vector.broadcast %35 : vector<1x128xf32> to vector<8x128xf32>
    %37 = arith.addf %34, %36 : vector<8x128xf32>
    %cst_15 = arith.constant dense<0xFF800000> : vector<8xf32>
    %38 = vector.multi_reduction <maximumf>, %37, %cst_15 [1] : vector<8x128xf32> to vector<8xf32>
    %39 = vector.shape_cast %38 : vector<8xf32> to vector<8x1xf32>
    %40 = vector.broadcast %39 : vector<8x1xf32> to vector<8x128xf32>
    %41 = arith.subf %37, %40 : vector<8x128xf32>
    %42 = math.exp %41 : vector<8x128xf32>
    %cst_16 = arith.constant dense<0.000000e+00> : vector<8xf32>
    %43 = vector.multi_reduction <add>, %42, %cst_16 [1] : vector<8x128xf32> to vector<8xf32>
    %44 = vector.shape_cast %43 : vector<8xf32> to vector<8x1xf32>
    %45 = math.log %44 : vector<8x1xf32>
    %46 = arith.addf %45, %39 : vector<8x1xf32>
    %47 = vector.broadcast %46 : vector<8x1xf32> to vector<8x128xf32>
    %48 = arith.subf %37, %47 : vector<8x128xf32>
    %c0_17 = arith.constant 0 : index
    %c0_18 = arith.constant 0 : index
    %49 = vector.load %arg7[%c0_17, %c0_18] : memref<8x128xf32, #tpu.memory_space<vmem>>, vector<8x128xf32>
    tpu.vector_store %arg7[%c0_17, %c0_18], %48 {strides = array<i32>} : memref<8x128xf32, #tpu.memory_space<vmem>>, vector<8x128xf32>,
    %c0_19 = arith.constant 0 : index
    %c0_20 = arith.constant 0 : index
    %50 = vector.load %arg8[%c0_19, %c0_20] : memref<8x128xf32, #tpu.memory_space<vmem>>, vector<8x128xf32>
    tpu.vector_store %arg8[%c0_19, %c0_20], %31 {strides = array<i32>} : memref<8x128xf32, #tpu.memory_space<vmem>>, vector<8x128xf32>,
    %c0_21 = arith.constant 0 : index
    %c0_22 = arith.constant 0 : index
    %51 = vector.load %arg9[%c0_21, %c0_22] : memref<8x128xf32, #tpu.memory_space<vmem>>, vector<8x128xf32>
    tpu.vector_store %arg9[%c0_21, %c0_22], %30 {strides = array<i32>} : memref<8x128xf32, #tpu.memory_space<vmem>>, vector<8x128xf32>,
    return
  }
  func.func @transform_0(%arg0: i32) -> (i32, i32) {
    %c0_i32 = arith.constant 0 : i32
    %c0_i32_0 = arith.constant 0 : i32
    return %arg0, %c0_i32 : i32, i32
  }
  func.func @transform_1(%arg0: i32) -> (i32, i32) {
    %c0_i32 = arith.constant 0 : i32
    %c0_i32_0 = arith.constant 0 : i32
    return %arg0, %c0_i32 : i32, i32
  }
  func.func @transform_2(%arg0: i32) -> (i32, i32) {
    %c0_i32 = arith.constant 0 : i32
    %c0_i32_0 = arith.constant 0 : i32
    %c0_i32_1 = arith.constant 0 : i32
    return %c0_i32, %c0_i32_0 : i32, i32
  }
  func.func @transform_3(%arg0: i32) -> (i32, i32) {
    %c0_i32 = arith.constant 0 : i32
    %c0_i32_0 = arith.constant 0 : i32
    %c0_i32_1 = arith.constant 0 : i32
    return %c0_i32, %c0_i32_0 : i32, i32
  }
  func.func @transform_4(%arg0: i32) -> (i32, i32) {
    %c0_i32 = arith.constant 0 : i32
    %c0_i32_0 = arith.constant 0 : i32
    %c0_i32_1 = arith.constant 0 : i32
    return %c0_i32, %c0_i32_0 : i32, i32
  }
  func.func @transform_5(%arg0: i32) -> (i32, i32) {
    %c0_i32 = arith.constant 0 : i32
    %c0_i32_0 = arith.constant 0 : i32
    %c0_i32_1 = arith.constant 0 : i32
    return %c0_i32, %c0_i32_0 : i32, i32
  }
  func.func @transform_6(%arg0: i32) -> (i32, i32) {
    %c0_i32 = arith.constant 0 : i32
    %c0_i32_0 = arith.constant 0 : i32
    return %arg0, %c0_i32 : i32, i32
  }
  func.func @transform_7(%arg0: i32) -> (i32, i32) {
    %c0_i32 = arith.constant 0 : i32
    %c0_i32_0 = arith.constant 0 : i32
    return %arg0, %c0_i32 : i32, i32
  }
  func.func @transform_8(%arg0: i32) -> (i32, i32) {
    %c0_i32 = arith.constant 0 : i32
    %c0_i32_0 = arith.constant 0 : i32
    return %arg0, %c0_i32 : i32, i32
  }
}

module attributes {stable_mosaic.version = 11 : i64} {
  func.func @_lstma_kernel(%arg0: i32, %arg1: memref<8x256xbf16, #tpu.memory_space<vmem>>, %arg2: memref<8x128xf32, #tpu.memory_space<vmem>>, %arg3: memref<256x512xbf16, #tpu.memory_space<vmem>>, %arg4: memref<1x512xf32, #tpu.memory_space<vmem>>, %arg5: memref<128x128xbf16, #tpu.memory_space<vmem>>, %arg6: memref<1x128xf32, #tpu.memory_space<vmem>>, %arg7: memref<8x128xf32, #tpu.memory_space<vmem>>, %arg8: memref<8x128xf32, #tpu.memory_space<vmem>>, %arg9: memref<8x128xf32, #tpu.memory_space<vmem>>) attributes {dimension_semantics = [#tpu.dimension_semantics<parallel>], iteration_bounds = array<i64: 1>, scalar_prefetch = 0 : i64, scratch_operands = 0 : i64, tpu.core_type = #tpu.core_type<tc>, window_params = [{transform_indices = @transform_0, window_bounds = array<i64: 8, 256>}, {transform_indices = @transform_1, window_bounds = array<i64: 8, 128>}, {pipeline_mode = #tpu.pipeline_mode<synchronous>, transform_indices = @transform_2, window_bounds = array<i64: 256, 512>}, {pipeline_mode = #tpu.pipeline_mode<synchronous>, transform_indices = @transform_3, window_bounds = array<i64: 1, 512>}, {pipeline_mode = #tpu.pipeline_mode<synchronous>, transform_indices = @transform_4, window_bounds = array<i64: 128, 128>}, {pipeline_mode = #tpu.pipeline_mode<synchronous>, transform_indices = @transform_5, window_bounds = array<i64: 1, 128>}, {transform_indices = @transform_6, window_bounds = array<i64: 8, 128>}, {transform_indices = @transform_7, window_bounds = array<i64: 8, 128>}, {transform_indices = @transform_8, window_bounds = array<i64: 8, 128>}]} {
    %c0 = arith.constant 0 : index
    %c0_0 = arith.constant 0 : index
    %0 = vector.load %arg1[%c0, %c0_0] : memref<8x256xbf16, #tpu.memory_space<vmem>>, vector<8x256xbf16>
    %c0_1 = arith.constant 0 : index
    %c0_2 = arith.constant 0 : index
    %1 = vector.load %arg3[%c0_1, %c0_2] : memref<256x512xbf16, #tpu.memory_space<vmem>>, vector<256x512xbf16>
    %cst = arith.constant dense<0.000000e+00> : vector<8x512xf32>
    %2 = tpu.matmul %0, %1, %cst {dimension_numbers = #tpu.dot_dimension_numbers<[1], [0], [0], [1], [0, 0, 1, 1], [], []>} : vector<8x256xbf16>, vector<256x512xbf16>, vector<8x512xf32> -> vector<8x512xf32>
    %c0_3 = arith.constant 0 : index
    %c0_4 = arith.constant 0 : index
    %3 = vector.load %arg4[%c0_3, %c0_4] : memref<1x512xf32, #tpu.memory_space<vmem>>, vector<1x512xf32>
    %4 = vector.broadcast %3 : vector<1x512xf32> to vector<8x512xf32>
    %5 = arith.addf %2, %4 : vector<8x512xf32>
    %6 = vector.extract_strided_slice %5 {offsets = [0, 0], sizes = [8, 128], strides = [1, 1]} : vector<8x512xf32> to vector<8x128xf32>
    %7 = arith.negf %6 : vector<8x128xf32>
    %8 = math.exp %7 : vector<8x128xf32>
    %cst_5 = arith.constant 1.000000e+00 : f32
    %9 = vector.broadcast %cst_5 : f32 to vector<8x128xf32>
    %10 = arith.addf %9, %8 : vector<8x128xf32>
    %11 = arith.divf %9, %10 : vector<8x128xf32>
    %12 = vector.extract_strided_slice %5 {offsets = [0, 128], sizes = [8, 128], strides = [1, 1]} : vector<8x512xf32> to vector<8x128xf32>
    %13 = arith.negf %12 : vector<8x128xf32>
    %14 = math.exp %13 : vector<8x128xf32>
    %cst_6 = arith.constant 1.000000e+00 : f32
    %15 = vector.broadcast %cst_6 : f32 to vector<8x128xf32>
    %16 = arith.addf %15, %14 : vector<8x128xf32>
    %17 = arith.divf %15, %16 : vector<8x128xf32>
    %18 = vector.extract_strided_slice %5 {offsets = [0, 256], sizes = [8, 128], strides = [1, 1]} : vector<8x512xf32> to vector<8x128xf32>
    %19 = arith.negf %18 : vector<8x128xf32>
    %20 = math.exp %19 : vector<8x128xf32>
    %cst_7 = arith.constant 1.000000e+00 : f32
    %21 = vector.broadcast %cst_7 : f32 to vector<8x128xf32>
    %22 = arith.addf %21, %20 : vector<8x128xf32>
    %23 = arith.divf %21, %22 : vector<8x128xf32>
    %24 = vector.extract_strided_slice %5 {offsets = [0, 384], sizes = [8, 128], strides = [1, 1]} : vector<8x512xf32> to vector<8x128xf32>
    %25 = math.tanh %24 : vector<8x128xf32>
    %c0_8 = arith.constant 0 : index
    %c0_9 = arith.constant 0 : index
    %26 = vector.load %arg2[%c0_8, %c0_9] : memref<8x128xf32, #tpu.memory_space<vmem>>, vector<8x128xf32>
    %27 = arith.mulf %17, %26 : vector<8x128xf32>
    %28 = arith.mulf %11, %25 : vector<8x128xf32>
    %29 = arith.addf %27, %28 : vector<8x128xf32>
    %30 = math.tanh %29 : vector<8x128xf32>
    %31 = arith.mulf %23, %30 : vector<8x128xf32>
    %32 = arith.truncf %31 : vector<8x128xf32> to vector<8x128xbf16>
    %c0_10 = arith.constant 0 : index
    %c0_11 = arith.constant 0 : index
    %33 = vector.load %arg5[%c0_10, %c0_11] : memref<128x128xbf16, #tpu.memory_space<vmem>>, vector<128x128xbf16>
    %cst_12 = arith.constant dense<0.000000e+00> : vector<8x128xf32>
    %34 = tpu.matmul %32, %33, %cst_12 {dimension_numbers = #tpu.dot_dimension_numbers<[1], [0], [0], [1], [0, 0, 1, 1], [], []>} : vector<8x128xbf16>, vector<128x128xbf16>, vector<8x128xf32> -> vector<8x128xf32>
    %c0_13 = arith.constant 0 : index
    %c0_14 = arith.constant 0 : index
    %35 = vector.load %arg6[%c0_13, %c0_14] : memref<1x128xf32, #tpu.memory_space<vmem>>, vector<1x128xf32>
    %36 = vector.broadcast %35 : vector<1x128xf32> to vector<8x128xf32>
    %37 = arith.addf %34, %36 : vector<8x128xf32>
    %cst_15 = arith.constant dense<0xFF800000> : vector<8xf32>
    %38 = vector.multi_reduction <maximumf>, %37, %cst_15 [1] : vector<8x128xf32> to vector<8xf32>
    %39 = vector.shape_cast %38 : vector<8xf32> to vector<8x1xf32>
    %40 = vector.broadcast %39 : vector<8x1xf32> to vector<8x128xf32>
    %41 = arith.subf %37, %40 : vector<8x128xf32>
    %42 = math.exp %41 : vector<8x128xf32>
    %cst_16 = arith.constant dense<0.000000e+00> : vector<8xf32>
    %43 = vector.multi_reduction <add>, %42, %cst_16 [1] : vector<8x128xf32> to vector<8xf32>
    %44 = vector.shape_cast %43 : vector<8xf32> to vector<8x1xf32>
    %45 = math.log %44 : vector<8x1xf32>
    %46 = arith.addf %45, %39 : vector<8x1xf32>
    %47 = vector.broadcast %46 : vector<8x1xf32> to vector<8x128xf32>
    %48 = arith.subf %37, %47 : vector<8x128xf32>
    %c0_17 = arith.constant 0 : index
    %c0_18 = arith.constant 0 : index
    %49 = vector.load %arg7[%c0_17, %c0_18] : memref<8x128xf32, #tpu.memory_space<vmem>>, vector<8x128xf32>
    tpu.vector_store %arg7[%c0_17, %c0_18], %48 {strides = array<i32>} : memref<8x128xf32, #tpu.memory_space<vmem>>, vector<8x128xf32>,
    %c0_19 = arith.constant 0 : index
    %c0_20 = arith.constant 0 : index
    %50 = vector.load %arg8[%c0_19, %c0_20] : memref<8x128xf32, #tpu.memory_space<vmem>>, vector<8x128xf32>
    tpu.vector_store %arg8[%c0_19, %c0_20], %31 {strides = array<i32>} : memref<8x128xf32, #tpu.memory_space<vmem>>, vector<8x128xf32>,
    %c0_21 = arith.constant 0 : index
    %c0_22 = arith.constant 0 : index
    %51 = vector.load %arg9[%c0_21, %c0_22] : memref<8x128xf32, #tpu.memory_space<vmem>>, vector<8x128xf32>
    tpu.vector_store %arg9[%c0_21, %c0_22], %30 {strides = array<i32>} : memref<8x128xf32, #tpu.memory_space<vmem>>, vector<8x128xf32>,
    return
  }
  func.func @transform_0(%arg0: i32) -> (i32, i32) {
    %c0_i32 = arith.constant 0 : i32
    %c0_i32_0 = arith.constant 0 : i32
    return %arg0, %c0_i32 : i32, i32
  }
  func.func @transform_1(%arg0: i32) -> (i32, i32) {
    %c0_i32 = arith.constant 0 : i32
    %c0_i32_0 = arith.constant 0 : i32
    return %arg0, %c0_i32 : i32, i32
  }
  func.func @transform_2(%arg0: i32) -> (i32, i32) {
    %c0_i32 = arith.constant 0 : i32
    %c0_i32_0 = arith.constant 0 : i32
    %c0_i32_1 = arith.constant 0 : i32
    return %c0_i32, %c0_i32_0 : i32, i32
  }
  func.func @transform_3(%arg0: i32) -> (i32, i32) {
    %c0_i32 = arith.constant 0 : i32
    %c0_i32_0 = arith.constant 0 : i32
    %c0_i32_1 = arith.constant 0 : i32
    return %c0_i32, %c0_i32_0 : i32, i32
  }
  func.func @transform_4(%arg0: i32) -> (i32, i32) {
    %c0_i32 = arith.constant 0 : i32
    %c0_i32_0 = arith.constant 0 : i32
    %c0_i32_1 = arith.constant 0 : i32
    return %c0_i32, %c0_i32_0 : i32, i32
  }
  func.func @transform_5(%arg0: i32) -> (i32, i32) {
    %c0_i32 = arith.constant 0 : i32
    %c0_i32_0 = arith.constant 0 : i32
    %c0_i32_1 = arith.constant 0 : i32
    return %c0_i32, %c0_i32_0 : i32, i32
  }
  func.func @transform_6(%arg0: i32) -> (i32, i32) {
    %c0_i32 = arith.constant 0 : i32
    %c0_i32_0 = arith.constant 0 : i32
    return %arg0, %c0_i32 : i32, i32
  }
  func.func @transform_7(%arg0: i32) -> (i32, i32) {
    %c0_i32 = arith.constant 0 : i32
    %c0_i32_0 = arith.constant 0 : i32
    return %arg0, %c0_i32 : i32, i32
  }
  func.func @transform_8(%arg0: i32) -> (i32, i32) {
    %c0_i32 = arith.constant 0 : i32
    %c0_i32_0 = arith.constant 0 : i32
    return %arg0, %c0_i32 : i32, i32
  }
}

</mosaic_0001>

<bundles_post_ra>
// kernel: tpu_custom_call.1
= control target key start
LH: loop header
LB: loop body
LE: loop exit
PB: predicated region body
PF: predicated region fallthrough
CT: control target
= control target key end

     0   :  { %14 = vsyncpa [#allocation3], 0  ;;  %s1281_s0 = inlined_call_operand.vmem [shape: bf16[8,256], index: 0, kind: input, shape index: {}]   ;;  %s1282_s1 = inlined_call_operand.hbm [shape: f32[8,128], index: 1, kind: input, shape index: {}, may-alias: {1,8}]   ;;  %s1283_s2 = inlined_call_operand.hbm [shape: bf16[256,512], index: 2, kind: input, shape index: {}]   ;;  %s1284_s3 = inlined_call_operand.vmem [shape: f32[1,512], index: 3, kind: input, shape index: {}]   ;;  %s1285_s4 = inlined_call_operand.hbm [shape: bf16[128,128], index: 4, kind: input, shape index: {}]   ;;  %s1286_s5 = inlined_call_operand.vmem [shape: f32[1,128], index: 5, kind: input, shape index: {}]   ;;  %s1287_s6 = inlined_call_operand.hbm [shape: f32[8,128], index: 6, kind: output, shape index: {0}]   ;;  %s1288_s7 = inlined_call_operand.hbm [shape: f32[8,128], index: 7, kind: output, shape index: {1}]   ;;  %s1289_s8 = inlined_call_operand.hbm [shape: f32[8,128], index: 8, kind: output, shape index: {2}, may-alias: {1,8}]  }
   0x1   :  { %15 = vsyncpa [#allocation6], 0 }
   0x2   :  { %16 = vsyncpa [#allocation4], 0 }
   0x3   :  { %17 = vsyncpa [#allocation10], 0  ;;  %s1143_s27 = smov [#allocation5]   ;;  %s1003_s9 = scalar_lea.hbm %s1283_s2, 8192 }
   0x4   :  { %s35_s28 = sshll.u32 %s1143_s27, 4  ;;  %p1004_p0 = scmp.ne.s32.totalorder %s1283_s2, %s1003_s9  ;;  %s36_s28 = int_to_ptr.vmem [resolvable:$true] %s35_s28 }
   0x5   :  { %p1007_p1 = scmp.lt.u32.totalorder %s1003_s9, %s1283_s2 }
   0x7   :  { %p1009_p2 = pnand %p1007_p1, %p1004_p0 }
   0x9   :  { %1012 = shalt.err (!%p1009_p2)
}
   0xa   :  { %s1013_s14 = scalar_lea.vmem %s36_s28, 8192  ;;  %p1018_p4 = scmp.lt.s32.totalorder %s36_s28, %s36_s28 }
   0xb   :  { %p1014_p3 = scmp.ne.s32.totalorder %s36_s28, %s1013_s14  ;;  %p1019_p5 = scmp.lt.s32.totalorder %s1013_s14, %s1013_s14 }
   0xd   :  { %p1020_p6 = por %p1019_p5, %p1018_p4 }
   0xf   :  { %p1021_p7 = pnand %p1020_p6, %p1014_p3 }
  0x11   :  { %1024 = shalt.err (!%p1021_p7)
}
  0x12   :  { %s1144_s15 = smov 256   ;;  %s1145_s16 = smov 16  }
  0x13   :  { %41 = dma.hbm_to_vmem [thread:$0]  %s1283_s2, 8192, %s36_s28, [#allocation6], %s1144_s15, %s1144_s15, %s1145_s16  }
  0x14   :  { %s1146_s19 = smov [#allocation2]   ;;  %s1147_s21 = smov [#allocation7]  }
  0x15   :  { %s26_s20 = sshll.u32 %s1146_s19, 4  ;;  %s49_s22 = sshll.u32 %s1147_s21, 4  ;;  %s27_s20 = int_to_ptr.vmem [resolvable:$true] %s26_s20  ;;  %s50_s22 = int_to_ptr.vmem [resolvable:$true] %s49_s22 }
  0x16   :  { %s1025_s25 = scalar_lea.hbm %s1282_s1, 128 }
  0x17   :  { %p1026_p8 = scmp.ne.s32.totalorder %s1282_s1, %s1025_s25  ;;  %p1029_p9 = scmp.lt.u32.totalorder %s1025_s25, %s1282_s1 }
  0x19   :  { %p1031_p10 = pnand %p1029_p9, %p1026_p8 }
  0x1b   :  { %1034 = shalt.err (!%p1031_p10)
}
  0x1c   :  { %s1035_s2 = scalar_lea.vmem %s27_s20, 128  ;;  %p1040_p12 = scmp.lt.s32.totalorder %s27_s20, %s27_s20 }
  0x1d   :  { %p1036_p11 = scmp.ne.s32.totalorder %s27_s20, %s1035_s2  ;;  %p1041_p13 = scmp.lt.s32.totalorder %s1035_s2, %s1035_s2 }
  0x1f   :  { %p1042_p0 = por %p1041_p13, %p1040_p12 }
  0x21   :  { %p1043_p1 = pnand %p1042_p0, %p1036_p11 }
  0x23   :  { %1046 = shalt.err (!%p1043_p1)
}
  0x24   :  { %29 = dma.hbm_to_vmem [thread:$0]  %s1282_s1, 128, %s27_s20, [#allocation3]  }
  0x25   :  { %s1047_s12 = scalar_lea.hbm %s1285_s4, 1024 }
  0x26   :  { %p1048_p2 = scmp.ne.s32.totalorder %s1285_s4, %s1047_s12  ;;  %p1051_p3 = scmp.lt.u32.totalorder %s1047_s12, %s1285_s4 }
  0x28   :  { %p1053_p4 = pnand %p1051_p3, %p1048_p2 }
  0x2a   :  { %1056 = shalt.err (!%p1053_p4)
}
  0x2b   :  { %s1057_s17 = scalar_lea.vmem %s50_s22, 1024  ;;  %p1062_p6 = scmp.lt.s32.totalorder %s50_s22, %s50_s22 }
  0x2c   :  { %p1058_p5 = scmp.ne.s32.totalorder %s50_s22, %s1057_s17  ;;  %p1063_p7 = scmp.lt.s32.totalorder %s1057_s17, %s1057_s17 }
  0x2e   :  { %p1064_p8 = por %p1063_p7, %p1062_p6 }
  0x30   :  { %p1065_p9 = pnand %p1064_p8, %p1058_p5 }
  0x32   :  { %1068 = shalt.err (!%p1065_p9)
}
  0x33   :  { %s1148_s1 = smov 64   ;;  %s1149_s18 = smov 4  }
  0x34   :  { %55 = dma.hbm_to_vmem [thread:$0]  %s1285_s4, 1024, %s50_s22, [#allocation6], %s1148_s1, %s1148_s1, %s1149_s18  }
  0x35   :  { %1135 = dma.done.wait [#allocation3], 128  }
  0x36   :  { %1136 = vsyncadd [#allocation3], 4294967168 }
  0x37   :  { %1137 = dma.done.wait [#allocation6], 9216  }
  0x38   :  { %1138 = vsyncadd [#allocation6], 4294958080  ;;  %v877_v0 = vld [vmem:[#allocation5 + $0x4] ss:$16 sps:$4 sm:$0xff]   ;;  %v879_v1 = vld [vmem:[#allocation5] ss:$16 sps:$4 sm:$0xff]  }
  0x39   :  { %482 = vmatprep.subr.bf16.mxu0 %v877_v0  ;;  %v880_v2 = vld [vmem:[#allocation5 + $0x24] ss:$16 sps:$4 sm:$0xff]   ;;  %v882_v3 = vld [vmem:[#allocation5 + $0x20] ss:$16 sps:$4 sm:$0xff]   ;;  %v888_v5 = vld [vmem:[#allocation5 + $0xc] ss:$16 sps:$4 sm:$0xff]  }
  0x3a   :  { %483 = vmatpush1.bf16.msra.mxu0 %v879_v1  ;;  %v883_v4 = vld [vmem:[#allocation5 + $0x44] ss:$16 sps:$4 sm:$0xff]   ;;  %v891_v6 = vld [vmem:[#allocation5 + $0x8] ss:$16 sps:$4 sm:$0xff]   ;;  %v885_v7 = vld [vmem:[#allocation5 + $0x40] ss:$16 sps:$4 sm:$0xff]   ;;  %523 = vmatprep.subr.bf16.mxu1 %v888_v5 }
  0x3b   :  { %484 = vmatprep.subr.bf16.mxu0 %v880_v2  ;;  %v886_v8 = vld [vmem:[#allocation5 + $0x64] ss:$16 sps:$4 sm:$0xff]   ;;  %524 = vmatpush1.bf16.msra.mxu1 %v891_v6  ;;  %v894_v9 = vld [vmem:[#allocation5 + $0x2c] ss:$16 sps:$4 sm:$0xff]   ;;  %v897_v10 = vld [vmem:[#allocation5 + $0x28] ss:$16 sps:$4 sm:$0xff]  }
  0x3c   :  { %525 = vmatprep.subr.bf16.mxu1 %v894_v9  ;;  %v890_v11 = vld [vmem:[#allocation5 + $0x60] ss:$16 sps:$4 sm:$0xff]   ;;  %v892_v12 = vld [vmem:[#allocation5 + $0x84] ss:$16 sps:$4 sm:$0xff]   ;;  %v900_v13 = vld [vmem:[#allocation5 + $0x4c] ss:$16 sps:$4 sm:$0xff]  }
  0x3d   :  { %v903_v14 = vld [vmem:[#allocation5 + $0x48] ss:$16 sps:$4 sm:$0xff]   ;;  %v906_v15 = vld [vmem:[#allocation5 + $0x6c] ss:$16 sps:$4 sm:$0xff]   ;;  %v896_v16 = vld [vmem:[#allocation5 + $0x80] ss:$16 sps:$4 sm:$0xff]  }
  0x3e   :  { %485 = vmatpush1.bf16.msra.mxu0 %v882_v3  ;;  %v898_v17 = vld [vmem:[#allocation5 + $0xa4] ss:$16 sps:$4 sm:$0xff]   ;;  %v909_v18 = vld [vmem:[#allocation5 + $0x68] ss:$16 sps:$4 sm:$0xff]   ;;  %v912_v19 = vld [vmem:[#allocation5 + $0x8c] ss:$16 sps:$4 sm:$0xff]  }
  0x3f   :  { %486 = vmatprep.subr.bf16.mxu0 %v883_v4  ;;  %526 = vmatpush1.bf16.msra.mxu1 %v897_v10  ;;  %v902_v20 = vld [vmem:[#allocation5 + $0xa0] ss:$16 sps:$4 sm:$0xff]   ;;  %v904_v21 = vld [vmem:[#allocation5 + $0xc4] ss:$16 sps:$4 sm:$0xff]   ;;  %v915_v22 = vld [vmem:[#allocation5 + $0x88] ss:$16 sps:$4 sm:$0xff]  }
  0x40   :  { %527 = vmatprep.subr.bf16.mxu1 %v900_v13  ;;  %v918_v23 = vld [vmem:[#allocation5 + $0xac] ss:$16 sps:$4 sm:$0xff]   ;;  %v908_v24 = vld [vmem:[#allocation5 + $0xc0] ss:$16 sps:$4 sm:$0xff]   ;;  %v910_v25 = vld [vmem:[#allocation5 + $0xe4] ss:$16 sps:$4 sm:$0xff]  }
  0x41   :  { %v921_v26 = vld [vmem:[#allocation5 + $0xa8] ss:$16 sps:$4 sm:$0xff]   ;;  %v924_v27 = vld [vmem:[#allocation5 + $0xcc] ss:$16 sps:$4 sm:$0xff]   ;;  %v914_v28 = vld [vmem:[#allocation5 + $0xe0] ss:$16 sps:$4 sm:$0xff]  }
  0x42   :  { %487 = vmatpush1.bf16.msra.mxu0 %v885_v7  ;;  %v916_v29 = vld [vmem:[#allocation5 + $0x104] ss:$16 sps:$4 sm:$0xff]   ;;  %v927_v30 = vld [vmem:[#allocation5 + $0xc8] ss:$16 sps:$4 sm:$0xff]   ;;  %v930_v31 = vld [vmem:[#allocation5 + $0xec] ss:$16 sps:$4 sm:$0xff]  }
  0x43   :  { %488 = vmatprep.subr.bf16.mxu0 %v886_v8  ;;  %528 = vmatpush1.bf16.msra.mxu1 %v903_v14  ;;  %v920_v32 = vld [vmem:[#allocation5 + $0x100] ss:$16 sps:$4 sm:$0xff]   ;;  %v922_v33 = vld [vmem:[#allocation5 + $0x124] ss:$16 sps:$4 sm:$0xff]   ;;  %v933_v34 = vld [vmem:[#allocation5 + $0xe8] ss:$16 sps:$4 sm:$0xff]  }
  0x44   :  { %529 = vmatprep.subr.bf16.mxu1 %v906_v15  ;;  %v936_v35 = vld [vmem:[#allocation5 + $0x10c] ss:$16 sps:$4 sm:$0xff]   ;;  %v926_v36 = vld [vmem:[#allocation5 + $0x120] ss:$16 sps:$4 sm:$0xff]   ;;  %v928_v37 = vld [vmem:[#allocation5 + $0x144] ss:$16 sps:$4 sm:$0xff]  }
  0x45   :  { %v939_v38 = vld [vmem:[#allocation5 + $0x108] ss:$16 sps:$4 sm:$0xff]   ;;  %v942_v39 = vld [vmem:[#allocation5 + $0x12c] ss:$16 sps:$4 sm:$0xff]   ;;  %v932_v40 = vld [vmem:[#allocation5 + $0x140] ss:$16 sps:$4 sm:$0xff]  }
  0x46   :  { %489 = vmatpush1.bf16.msra.mxu0 %v890_v11  ;;  %v68_v41 = vld [vmem:[%s1281_s0] sm:$0xff]  ;;  %v934_v42 = vld [vmem:[#allocation5 + $0x164] ss:$16 sps:$4 sm:$0xff]   ;;  %v938_v45 = vld [vmem:[#allocation5 + $0x160] ss:$16 sps:$4 sm:$0xff]   ;;  %v1150_v4 = vmov 0.0  }
  0x47   :  { %490 = vmatprep.subr.bf16.mxu0 %v892_v12  ;;  %530 = vmatpush1.bf16.msra.mxu1 %v909_v18  ;;  %v759_v43 = vcombine.high %v68_v41, %v68_v41  ;;  %v945_v44 = vld [vmem:[#allocation5 + $0x128] ss:$16 sps:$4 sm:$0xff]   ;;  %v948_v46 = vld [vmem:[#allocation5 + $0x14c] ss:$16 sps:$4 sm:$0xff]   ;;  %v940_v47 = vld [vmem:[#allocation5 + $0x184] ss:$16 sps:$4 sm:$0xff]   ;;  %v758_v1 = vcombine.low %v68_v41, %v68_v41  ;;  %v135_v12 = vlaneseq }
  0x48   :  { %531 = vmatprep.subr.bf16.mxu1 %v912_v19  ;;  %v951_v48 = vld [vmem:[#allocation5 + $0x148] ss:$16 sps:$4 sm:$0xff]   ;;  %v954_v49 = vld [vmem:[#allocation5 + $0x16c] ss:$16 sps:$4 sm:$0xff]   ;;  %v944_v50 = vld [vmem:[#allocation5 + $0x180] ss:$16 sps:$4 sm:$0xff]  }
  0x49   :  { %514 = vmatprep.mubr.bf16.mxu0 %v759_v43  ;;  %555 = vmatprep.mubr.bf16.mxu1 %v759_v43  ;;  %v946_v51 = vld [vmem:[#allocation5 + $0x1a4] ss:$16 sps:$4 sm:$0xff]   ;;  %v957_v52 = vld [vmem:[#allocation5 + $0x168] ss:$16 sps:$4 sm:$0xff]   ;;  %v960_v53 = vld [vmem:[#allocation5 + $0x18c] ss:$16 sps:$4 sm:$0xff]  }
  0x4a   :  { %491 = vmatpush1.bf16.msra.mxu0 %v896_v16  ;;  %v950_v54 = vld [vmem:[#allocation5 + $0x1a0] ss:$16 sps:$4 sm:$0xff]   ;;  %v952_v55 = vld [vmem:[#allocation5 + $0x1c4] ss:$16 sps:$4 sm:$0xff]   ;;  %v963_v56 = vld [vmem:[#allocation5 + $0x188] ss:$16 sps:$4 sm:$0xff]  }
  0x4b   :  { %492 = vmatprep.subr.bf16.mxu0 %v898_v17  ;;  %532 = vmatpush1.bf16.msra.mxu1 %v915_v22  ;;  %v966_v57 = vld [vmem:[#allocation5 + $0x1ac] ss:$16 sps:$4 sm:$0xff]   ;;  %v956_v58 = vld [vmem:[#allocation5 + $0x1c0] ss:$16 sps:$4 sm:$0xff]   ;;  %v958_v59 = vld [vmem:[#allocation5 + $0x1e4] ss:$16 sps:$4 sm:$0xff]  }
  0x4c   :  { %533 = vmatprep.subr.bf16.mxu1 %v918_v23  ;;  %v968_v60 = vld [vmem:[#allocation5 + $0x1a8] ss:$16 sps:$4 sm:$0xff]   ;;  %v969_v61 = vld [vmem:[#allocation5 + $0x1cc] ss:$16 sps:$4 sm:$0xff]   ;;  %v962_v62 = vld [vmem:[#allocation5 + $0x1e0] ss:$16 sps:$4 sm:$0xff]  }
  0x4d   :  { %v971_v63 = vld [vmem:[#allocation5 + $0x1c8] ss:$16 sps:$4 sm:$0xff]   ;;  %v972_v0 = vld [vmem:[#allocation5 + $0x1ec] ss:$16 sps:$4 sm:$0xff]   ;;  %v975_v3 = vld [vmem:[#allocation7] sm:$0xff]   ;;  %vm1151_vm0 = vmmov 0  }
  0x4e   :  { %493 = vmatpush1.bf16.msra.mxu0 %v902_v20  ;;  %v974_v2 = vld [vmem:[#allocation5 + $0x1e8] ss:$16 sps:$4 sm:$0xff]   ;;  %v977_v6 = vld [vmem:[#allocation7 + $0x10] sm:$0xff]   ;;  %v979_v8 = vld [vmem:[#allocation7 + $0x20] sm:$0xff]   ;;  %v136_v13 = vshrl.u32 %v135_v12, 7  ;;  %s1152_s24 = smov [#allocation9]  }
  0x4f   :  { %494 = vmatprep.subr.bf16.mxu0 %v904_v21  ;;  %534 = vmatpush1.bf16.msra.mxu1 %v921_v26  ;;  %v976_v5 = vld [vmem:[#allocation7 + $0x8] sm:$0xff]   ;;  %v978_v7 = vld [vmem:[#allocation7 + $0x18] sm:$0xff]   ;;  %v981_v10 = vld [vmem:[#allocation7 + $0x30] sm:$0xff]   ;;  %s731_s25 = sshll.u32 %s1152_s24, 4  ;;  %s732_s25 = int_to_ptr.vmem [resolvable:$true] %s731_s25 }
  0x50   :  { %535 = vmatprep.subr.bf16.mxu1 %v924_v27  ;;  %v980_v9 = vld [vmem:[#allocation7 + $0x28] sm:$0xff]   ;;  %v982_v11 = vld [vmem:[#allocation7 + $0x38] sm:$0xff]   ;;  %v137_v14 = vsub.s32 0, %v136_v13  ;;  %v141_v16 = vsub.s32 1, %v136_v13  ;;  %v145_v19 = vsub.s32 2, %v136_v13  ;;  %s1069_s26 = scalar_lea.vmem %s732_s25, 128  ;;  %p1074_p11 = scmp.lt.s32.totalorder %s732_s25, %s732_s25 }
  0x51   :  { %v133_v15 = vld [vmem:[%s1284_s3] sm:$0xf]  ;;  %p1070_p10 = scmp.ne.s32.totalorder %s732_s25, %s1069_s26  ;;  %p1075_p12 = scmp.lt.s32.totalorder %s1069_s26, %s1069_s26 }
  0x52   :  { %495 = vmatpush1.bf16.msra.mxu0 %v908_v24  ;;  %v138_v17 = vrot.slane %v133_v15, %v137_v14  ;;  %v142_v18 = vrot.slane %v133_v15, %v141_v16  ;;  %v146_v27 = vrot.slane %v133_v15, %v145_v19 }
  0x53   :  { %496 = vmatprep.subr.bf16.mxu0 %v910_v25  ;;  %536 = vmatpush1.bf16.msra.mxu1 %v927_v30  ;;  %p1076_p13 = por %p1075_p12, %p1074_p11 }
  0x54   :  { %537 = vmatprep.subr.bf16.mxu1 %v930_v31 }
  0x55   :  { %p1077_p0 = pnand %p1076_p13, %p1070_p10 }
  0x56   :  { %497 = vmatpush1.bf16.msra.mxu0 %v914_v28 }
  0x57   :  { %498 = vmatprep.subr.bf16.mxu0 %v916_v29  ;;  %538 = vmatpush1.bf16.msra.mxu1 %v933_v34  ;;  %v149_v29 = vsub.s32 3, %v136_v13 }
  0x58   :  { %539 = vmatprep.subr.bf16.mxu1 %v936_v35 }
  0x59   :  { %v150_v34 = vrot.slane %v133_v15, %v149_v29 }
  0x5a   :  { %499 = vmatpush1.bf16.msra.mxu0 %v920_v32 }
  0x5b   :  { %500 = vmatprep.subr.bf16.mxu0 %v922_v33  ;;  %540 = vmatpush1.bf16.msra.mxu1 %v939_v38 }
  0x5c   :  { %541 = vmatprep.subr.bf16.mxu1 %v942_v39 }
  0x5e   :  { %501 = vmatpush1.bf16.msra.mxu0 %v926_v36 }
  0x5f   :  { %502 = vmatprep.subr.bf16.mxu0 %v928_v37  ;;  %542 = vmatpush1.bf16.msra.mxu1 %v945_v44  ;;  %v583_v44 = vld [vmem:[#allocation2] sm:$0xff] }
  0x60   :  { %543 = vmatprep.subr.bf16.mxu1 %v948_v46 }
  0x62   :  { %503 = vmatpush1.bf16.msra.mxu0 %v932_v40 }
  0x63   :  { %504 = vmatprep.subr.bf16.mxu0 %v934_v42  ;;  %544 = vmatpush1.bf16.msra.mxu1 %v951_v48 }
  0x64   :  { %545 = vmatprep.subr.bf16.mxu1 %v954_v49 }
  0x66   :  { %505 = vmatpush1.bf16.msra.mxu0 %v938_v45 }
  0x67   :  { %506 = vmatprep.subr.bf16.mxu0 %v940_v47  ;;  %546 = vmatpush1.bf16.msra.mxu1 %v957_v52 }
  0x68   :  { %547 = vmatprep.subr.bf16.mxu1 %v960_v53 }
  0x6a   :  { %507 = vmatpush1.bf16.msra.mxu0 %v944_v50 }
  0x6b   :  { %508 = vmatprep.subr.bf16.mxu0 %v946_v51  ;;  %548 = vmatpush1.bf16.msra.mxu1 %v963_v56 }
  0x6c   :  { %549 = vmatprep.subr.bf16.mxu1 %v966_v57 }
  0x6e   :  { %509 = vmatpush1.bf16.msra.mxu0 %v950_v54 }
  0x6f   :  { %510 = vmatprep.subr.bf16.mxu0 %v952_v55  ;;  %550 = vmatpush1.bf16.msra.mxu1 %v968_v60  ;;  %v827_v55 = vld [vmem:[%s1286_s5] ss:$0 sm:$0xff] }
  0x70   :  { %551 = vmatprep.subr.bf16.mxu1 %v969_v61 }
  0x72   :  { %511 = vmatpush1.bf16.msra.mxu0 %v956_v58 }
  0x73   :  { %512 = vmatprep.subr.bf16.mxu0 %v958_v59  ;;  %552 = vmatpush1.bf16.msra.mxu1 %v971_v63 }
  0x74   :  { %553 = vmatprep.subr.bf16.mxu1 %v972_v0 }
  0x76   :  { %513 = vmatpush1.bf16.msra.mxu0 %v962_v62 }
  0x77   :  { %554 = vmatpush1.bf16.msra.mxu1 %v974_v2  ;;  %845 = vmatprep.subr.bf16.mxu0 %v1150_v4 }
  0x79   :  { %515 = vmatmul.mubr.bf16.vlgmr.msra.gmra.mrb[0].mxu0 %v758_v1 }
  0x7a   :  { %556 = vmatmul.mubr.bf16.vlgmr.msra.gmra.mrb[0].mxu1 %v758_v1  ;;  %846 = vmatpush3.bf16.msra.mxu0 %v975_v3 }
  0x7b   :  { %847 = vmatprep.subr.bf16.mxu0 %v1150_v4  ;;  %861 = vmatprep.mubr.msk.bf16.mxu0 %vm1151_vm0, %v1150_v4 }
  0x7e   :  { %848 = vmatpush3.bf16.msra.mxu0 %v976_v5 }
  0x7f   :  { %849 = vmatprep.subr.bf16.mxu0 %v1150_v4 }
  0x82   :  { %850 = vmatpush3.bf16.msra.mxu0 %v977_v6 }
  0x83   :  { %851 = vmatprep.subr.bf16.mxu0 %v1150_v4 }
  0x86   :  { %852 = vmatpush3.bf16.msra.mxu0 %v978_v7 }
  0x87   :  { %853 = vmatprep.subr.bf16.mxu0 %v1150_v4 }
  0x8a   :  { %854 = vmatpush3.bf16.msra.mxu0 %v979_v8 }
  0x8b   :  { %855 = vmatprep.subr.bf16.mxu0 %v1150_v4 }
  0x8e   :  { %856 = vmatpush3.bf16.msra.mxu0 %v980_v9 }
  0x8f   :  { %857 = vmatprep.subr.bf16.mxu0 %v1150_v4 }
  0x92   :  { %858 = vmatpush3.bf16.msra.mxu0 %v981_v10 }
  0x93   :  { %859 = vmatprep.subr.bf16.mxu0 %v1150_v4 }
  0x96   :  { %860 = vmatpush3.bf16.msra.mxu0 %v982_v11 }
 0x14c   :  { %v516_v20 = vpop.f32.mrb[0].mxu0 }
 0x14d   :  { %v517_v21 = vadd.f32 %v516_v20, %v138_v17  ;;  %v518_v22 = vpop.f32.mrb[1].mxu0  ;;  %v557_v30 = vpop.f32.mrb[0].mxu1 }
 0x14e   :  { %v519_v23 = vadd.f32 %v518_v22, %v142_v18  ;;  %v520_v24 = vpop.f32.mrb[2].mxu0  ;;  %v559_v31 = vpop.f32.mrb[1].mxu1  ;;  %v558_v32 = vadd.f32 %v557_v30, %v146_v27 }
 0x14f   :  { %v824_v25 = vmul.f32 -1.442695, %v517_v21  ;;  %v521_v26 = vpop.f32.mrb[3].mxu0  ;;  %v561_v33 = vpop.f32.mrb[2].mxu1  ;;  %v560_v37 = vadd.f32 %v559_v31, %v150_v34 }
 0x150   :  { %v825_v28 = vmul.f32 -1.442695, %v519_v23  ;;  %v562_v35 = vpop.f32.mrb[3].mxu1  ;;  %v826_v36 = vmul.f32 -1.442695, %v558_v32 }
 0x151   :  { %983 = vpow2.f32 %v824_v25 }
 0x152   :  { %985 = vpow2.f32 %v825_v28 }
 0x153   :  { %987 = vpow2.f32 %v826_v36 }
 0x154   :  { %989 = vtanh.f32 %v560_v37 }
 0x15b   :  { %v984_v38 = vpop.eup %983 }
 0x15c   :  { %v986_v39 = vpop.eup %985  ;;  %v567_v40 = vadd.f32 1.0, %v984_v38 }
 0x15d   :  { %v573_v41 = vadd.f32 1.0, %v986_v39  ;;  %v988_v42 = vpop.eup %987 }
 0x15e   :  { %991 = vrcp.f32 %v567_v40  ;;  %v990_v43 = vpop.eup %989  ;;  %v579_v46 = vadd.f32 1.0, %v988_v42 }
 0x15f   :  { %993 = vrcp.f32 %v573_v41 }
 0x160   :  { %995 = vrcp.f32 %v579_v46 }
 0x168   :  { %v992_v45 = vpop.eup %991 }
 0x169   :  { %v994_v47 = vpop.eup %993  ;;  %v585_v48 = vmul.f32 %v992_v45, %v990_v43 }
 0x16a   :  { %v584_v49 = vmul.f32 %v994_v47, %v583_v44  ;;  %v996_v51 = vpop.eup %995 }
 0x16c   :  { %v586_v50 = vadd.f32 %v585_v48, %v584_v49 }
 0x16e   :  { %997 = vtanh.f32 %v586_v50 }
 0x178   :  { %v998_v52 = vpop.eup %997 }
 0x179   :  { %714 = vst [vmem:[#allocation11] sm:$0xff] %v998_v52  ;;  %v588_v53 = vmul.f32 %v998_v52, %v996_v51 }
 0x17b   :  { %v589_v54 = vpack.c.bf16 %v588_v53, %v588_v53  ;;  %713 = vst [vmem:[#allocation9] sm:$0xff] %v588_v53 }
 0x17d   :  { %862 = vmatmul.mubr.bf16.vlgmr.msra.gmra.mrb[4].mxu0 %v589_v54 }
 0x250   :  { %v695_v56 = vpop.f32.mrb[4].mxu0 }
 0x251   :  { %v696_v57 = vadd.f32 %v827_v55, %v695_v56  ;;  %v863_v58 = vpop.f32.mrb[5].mxu0 }
 0x252   :  { %v698_v59 = vpop.f32.mrb[6].mxu0 }
 0x253   :  { %701 = vmax.xlane.f32.xlu0 %v696_v57  ;;  %v864_v60 = vpop.f32.mrb[7].mxu0 }
 0x2e0   :  { %v702_v61 = vpop.xlane.xlu0 %701 }
 0x2e1   :  { %v703_v62 = vsub.f32 %v696_v57, %v702_v61 }
 0x2e3   :  { %v704_v63 = vmul.f32 1.442695, %v703_v62 }
 0x2e5   :  { %999 = vpow2.f32 %v704_v63 }
 0x2ef   :  { %v1000_v0 = vpop.eup %999 }
 0x2f0   :  { %706 = vadd.xlane.f32.xlu0 %v1000_v0 }
 0x2f1   :  { %1080 = shalt.err (!%p1077_p0)
}
 0x2f2   :  { %s1081_s29 = scalar_lea.hbm %s1288_s7, 128 }
 0x2f3   :  { %p1082_p1 = scmp.ne.s32.totalorder %s1288_s7, %s1081_s29  ;;  %p1085_p2 = scmp.lt.u32.totalorder %s1081_s29, %s1288_s7 }
 0x2f5   :  { %p1087_p3 = pnand %p1085_p2, %p1082_p1 }
 0x2f7   :  { %1090 = shalt.err (!%p1087_p3)
}
 0x2f8   :  { %734 = dma.vmem_to_hbm [thread:$0]  %s732_s25, 128, %s1288_s7, [#allocation10]  }
 0x2f9   :  { %s1153_s12 = smov [#allocation11]  }
 0x2fa   :  { %s741_s13 = sshll.u32 %s1153_s12, 4  ;;  %s742_s13 = int_to_ptr.vmem [resolvable:$true] %s741_s13 }
 0x2fb   :  { %s1091_s14 = scalar_lea.vmem %s742_s13, 128  ;;  %p1096_p5 = scmp.lt.s32.totalorder %s742_s13, %s742_s13 }
 0x2fc   :  { %p1092_p4 = scmp.ne.s32.totalorder %s742_s13, %s1091_s14  ;;  %p1097_p6 = scmp.lt.s32.totalorder %s1091_s14, %s1091_s14 }
 0x2fe   :  { %p1098_p7 = por %p1097_p6, %p1096_p5 }
 0x300   :  { %p1099_p8 = pnand %p1098_p7, %p1092_p4 }
 0x302   :  { %1102 = shalt.err (!%p1099_p8)
}
 0x303   :  { %s1103_s17 = scalar_lea.hbm %s1289_s8, 128 }
 0x304   :  { %p1104_p9 = scmp.ne.s32.totalorder %s1289_s8, %s1103_s17  ;;  %p1107_p10 = scmp.lt.u32.totalorder %s1103_s17, %s1289_s8 }
 0x306   :  { %p1109_p11 = pnand %p1107_p10, %p1104_p9 }
 0x308   :  { %1112 = shalt.err (!%p1109_p11)
}
 0x309   :  { %744 = dma.vmem_to_hbm [thread:$0]  %s742_s13, 128, %s1289_s8, [#allocation10]  }
 0x30a   :  { %s1154_s21 = smov [#allocation8]  }
 0x30b   :  { %s721_s0 = sshll.u32 %s1154_s21, 4  ;;  %s722_s0 = int_to_ptr.vmem [resolvable:$true] %s721_s0 }
 0x30c   :  { %s1113_s22 = scalar_lea.vmem %s722_s0, 128  ;;  %p1118_p13 = scmp.lt.s32.totalorder %s722_s0, %s722_s0 }
 0x30d   :  { %p1114_p12 = scmp.ne.s32.totalorder %s722_s0, %s1113_s22  ;;  %p1119_p0 = scmp.lt.s32.totalorder %s1113_s22, %s1113_s22 }
 0x30f   :  { %p1120_p1 = por %p1119_p0, %p1118_p13 }
 0x311   :  { %p1121_p2 = pnand %p1120_p1, %p1114_p12 }
 0x37d   :  { %v707_v1 = vpop.xlane.xlu0 %706 }
 0x37e   :  { %1001 = vlog2.f32 %v707_v1 }
 0x388   :  { %v1002_v2 = vpop.eup %1001 }
 0x389   :  { %v709_v3 = vmul.f32 0.6931472, %v1002_v2 }
 0x38b   :  { %v710_v4 = vadd.f32 %v709_v3, %v702_v61 }
 0x38d   :  { %v711_v5 = vsub.f32 %v696_v57, %v710_v4 }
 0x38f   :  { %712 = vst [vmem:[#allocation8] sm:$0xff] %v711_v5 }
 0x390   :  { %1124 = shalt.err (!%p1121_p2)
}
 0x391   :  { %s1125_s8 = scalar_lea.hbm %s1287_s6, 128 }
 0x392   :  { %p1126_p3 = scmp.ne.s32.totalorder %s1287_s6, %s1125_s8  ;;  %p1129_p4 = scmp.lt.u32.totalorder %s1125_s8, %s1287_s6 }
 0x394   :  { %p1131_p5 = pnand %p1129_p4, %p1126_p3 }
 0x396   :  { %1134 = shalt.err (!%p1131_p5)
}
 0x397   :  { %724 = dma.vmem_to_hbm [thread:$0]  %s722_s0, 128, %s1287_s6, [#allocation4]  }
 0x398   :  { %1139 = dma.done.wait [#allocation4], 128  }
 0x399   :  { %1140 = vsyncadd [#allocation4], 4294967168 }
 0x39a   :  { %1141 = dma.done.wait [#allocation10], 256  }
 0x39b   :  { %1142 = vsyncadd [#allocation10], 4294967040 }
 0x39c   :  { %754 = vsyncpa [#allocation3], 1 }
 0x39d   :  { %755 = vsyncpa [#allocation6], 1 }
 0x39e   :  { %756 = vsyncpa [#allocation4], 1 }
 0x39f   :  { %757 = vsyncpa [#allocation10], 1 }

// kernel: tpu_custom_call.1
= control target key start
LH: loop header
LB: loop body
LE: loop exit
PB: predicated region body
PF: predicated region fallthrough
CT: control target
= control target key end

     0   :  { %14 = vsyncpa [#allocation3], 0  ;;  %s1281_s0 = inlined_call_operand.vmem [shape: bf16[8,256], index: 0, kind: input, shape index: {}]   ;;  %s1282_s1 = inlined_call_operand.hbm [shape: f32[8,128], index: 1, kind: input, shape index: {}, may-alias: {1,8}]   ;;  %s1283_s2 = inlined_call_operand.hbm [shape: bf16[256,512], index: 2, kind: input, shape index: {}]   ;;  %s1284_s3 = inlined_call_operand.vmem [shape: f32[1,512], index: 3, kind: input, shape index: {}]   ;;  %s1285_s4 = inlined_call_operand.hbm [shape: bf16[128,128], index: 4, kind: input, shape index: {}]   ;;  %s1286_s5 = inlined_call_operand.vmem [shape: f32[1,128], index: 5, kind: input, shape index: {}]   ;;  %s1287_s6 = inlined_call_operand.hbm [shape: f32[8,128], index: 6, kind: output, shape index: {0}]   ;;  %s1288_s7 = inlined_call_operand.hbm [shape: f32[8,128], index: 7, kind: output, shape index: {1}]   ;;  %s1289_s8 = inlined_call_operand.hbm [shape: f32[8,128], index: 8, kind: output, shape index: {2}, may-alias: {1,8}]  }
   0x1   :  { %15 = vsyncpa [#allocation6], 0 }
   0x2   :  { %16 = vsyncpa [#allocation4], 0 }
   0x3   :  { %17 = vsyncpa [#allocation10], 0  ;;  %s1143_s27 = smov [#allocation5]   ;;  %s1003_s9 = scalar_lea.hbm %s1283_s2, 8192 }
   0x4   :  { %s35_s28 = sshll.u32 %s1143_s27, 4  ;;  %p1004_p0 = scmp.ne.s32.totalorder %s1283_s2, %s1003_s9  ;;  %s36_s28 = int_to_ptr.vmem [resolvable:$true] %s35_s28 }
   0x5   :  { %p1007_p1 = scmp.lt.u32.totalorder %s1003_s9, %s1283_s2 }
   0x7   :  { %p1009_p2 = pnand %p1007_p1, %p1004_p0 }
   0x9   :  { %1012 = shalt.err (!%p1009_p2)
}
   0xa   :  { %s1013_s14 = scalar_lea.vmem %s36_s28, 8192  ;;  %p1018_p4 = scmp.lt.s32.totalorder %s36_s28, %s36_s28 }
   0xb   :  { %p1014_p3 = scmp.ne.s32.totalorder %s36_s28, %s1013_s14  ;;  %p1019_p5 = scmp.lt.s32.totalorder %s1013_s14, %s1013_s14 }
   0xd   :  { %p1020_p6 = por %p1019_p5, %p1018_p4 }
   0xf   :  { %p1021_p7 = pnand %p1020_p6, %p1014_p3 }
  0x11   :  { %1024 = shalt.err (!%p1021_p7)
}
  0x12   :  { %s1144_s15 = smov 256   ;;  %s1145_s16 = smov 16  }
  0x13   :  { %41 = dma.hbm_to_vmem [thread:$0]  %s1283_s2, 8192, %s36_s28, [#allocation6], %s1144_s15, %s1144_s15, %s1145_s16  }
  0x14   :  { %s1146_s19 = smov [#allocation2]   ;;  %s1147_s21 = smov [#allocation7]  }
  0x15   :  { %s26_s20 = sshll.u32 %s1146_s19, 4  ;;  %s49_s22 = sshll.u32 %s1147_s21, 4  ;;  %s27_s20 = int_to_ptr.vmem [resolvable:$true] %s26_s20  ;;  %s50_s22 = int_to_ptr.vmem [resolvable:$true] %s49_s22 }
  0x16   :  { %s1025_s25 = scalar_lea.hbm %s1282_s1, 128 }
  0x17   :  { %p1026_p8 = scmp.ne.s32.totalorder %s1282_s1, %s1025_s25  ;;  %p1029_p9 = scmp.lt.u32.totalorder %s1025_s25, %s1282_s1 }
  0x19   :  { %p1031_p10 = pnand %p1029_p9, %p1026_p8 }
  0x1b   :  { %1034 = shalt.err (!%p1031_p10)
}
  0x1c   :  { %s1035_s2 = scalar_lea.vmem %s27_s20, 128  ;;  %p1040_p12 = scmp.lt.s32.totalorder %s27_s20, %s27_s20 }
  0x1d   :  { %p1036_p11 = scmp.ne.s32.totalorder %s27_s20, %s1035_s2  ;;  %p1041_p13 = scmp.lt.s32.totalorder %s1035_s2, %s1035_s2 }
  0x1f   :  { %p1042_p0 = por %p1041_p13, %p1040_p12 }
  0x21   :  { %p1043_p1 = pnand %p1042_p0, %p1036_p11 }
  0x23   :  { %1046 = shalt.err (!%p1043_p1)
}
  0x24   :  { %29 = dma.hbm_to_vmem [thread:$0]  %s1282_s1, 128, %s27_s20, [#allocation3]  }
  0x25   :  { %s1047_s12 = scalar_lea.hbm %s1285_s4, 1024 }
  0x26   :  { %p1048_p2 = scmp.ne.s32.totalorder %s1285_s4, %s1047_s12  ;;  %p1051_p3 = scmp.lt.u32.totalorder %s1047_s12, %s1285_s4 }
  0x28   :  { %p1053_p4 = pnand %p1051_p3, %p1048_p2 }
  0x2a   :  { %1056 = shalt.err (!%p1053_p4)
}
  0x2b   :  { %s1057_s17 = scalar_lea.vmem %s50_s22, 1024  ;;  %p1062_p6 = scmp.lt.s32.totalorder %s50_s22, %s50_s22 }
  0x2c   :  { %p1058_p5 = scmp.ne.s32.totalorder %s50_s22, %s1057_s17  ;;  %p1063_p7 = scmp.lt.s32.totalorder %s1057_s17, %s1057_s17 }
  0x2e   :  { %p1064_p8 = por %p1063_p7, %p1062_p6 }
  0x30   :  { %p1065_p9 = pnand %p1064_p8, %p1058_p5 }
  0x32   :  { %1068 = shalt.err (!%p1065_p9)
}
  0x33   :  { %s1148_s1 = smov 64   ;;  %s1149_s18 = smov 4  }
  0x34   :  { %55 = dma.hbm_to_vmem [thread:$0]  %s1285_s4, 1024, %s50_s22, [#allocation6], %s1148_s1, %s1148_s1, %s1149_s18  }
  0x35   :  { %1135 = dma.done.wait [#allocation3], 128  }
  0x36   :  { %1136 = vsyncadd [#allocation3], 4294967168 }
  0x37   :  { %1137 = dma.done.wait [#allocation6], 9216  }
  0x38   :  { %1138 = vsyncadd [#allocation6], 4294958080  ;;  %v877_v0 = vld [vmem:[#allocation5 + $0x4] ss:$16 sps:$4 sm:$0xff]   ;;  %v879_v1 = vld [vmem:[#allocation5] ss:$16 sps:$4 sm:$0xff]  }
  0x39   :  { %482 = vmatprep.subr.bf16.mxu0 %v877_v0  ;;  %v880_v2 = vld [vmem:[#allocation5 + $0x24] ss:$16 sps:$4 sm:$0xff]   ;;  %v882_v3 = vld [vmem:[#allocation5 + $0x20] ss:$16 sps:$4 sm:$0xff]   ;;  %v888_v5 = vld [vmem:[#allocation5 + $0xc] ss:$16 sps:$4 sm:$0xff]  }
  0x3a   :  { %483 = vmatpush1.bf16.msra.mxu0 %v879_v1  ;;  %v883_v4 = vld [vmem:[#allocation5 + $0x44] ss:$16 sps:$4 sm:$0xff]   ;;  %v891_v6 = vld [vmem:[#allocation5 + $0x8] ss:$16 sps:$4 sm:$0xff]   ;;  %v885_v7 = vld [vmem:[#allocation5 + $0x40] ss:$16 sps:$4 sm:$0xff]   ;;  %523 = vmatprep.subr.bf16.mxu1 %v888_v5 }
  0x3b   :  { %484 = vmatprep.subr.bf16.mxu0 %v880_v2  ;;  %v886_v8 = vld [vmem:[#allocation5 + $0x64] ss:$16 sps:$4 sm:$0xff]   ;;  %524 = vmatpush1.bf16.msra.mxu1 %v891_v6  ;;  %v894_v9 = vld [vmem:[#allocation5 + $0x2c] ss:$16 sps:$4 sm:$0xff]   ;;  %v897_v10 = vld [vmem:[#allocation5 + $0x28] ss:$16 sps:$4 sm:$0xff]  }
  0x3c   :  { %525 = vmatprep.subr.bf16.mxu1 %v894_v9  ;;  %v890_v11 = vld [vmem:[#allocation5 + $0x60] ss:$16 sps:$4 sm:$0xff]   ;;  %v892_v12 = vld [vmem:[#allocation5 + $0x84] ss:$16 sps:$4 sm:$0xff]   ;;  %v900_v13 = vld [vmem:[#allocation5 + $0x4c] ss:$16 sps:$4 sm:$0xff]  }
  0x3d   :  { %v903_v14 = vld [vmem:[#allocation5 + $0x48] ss:$16 sps:$4 sm:$0xff]   ;;  %v906_v15 = vld [vmem:[#allocation5 + $0x6c] ss:$16 sps:$4 sm:$0xff]   ;;  %v896_v16 = vld [vmem:[#allocation5 + $0x80] ss:$16 sps:$4 sm:$0xff]  }
  0x3e   :  { %485 = vmatpush1.bf16.msra.mxu0 %v882_v3  ;;  %v898_v17 = vld [vmem:[#allocation5 + $0xa4] ss:$16 sps:$4 sm:$0xff]   ;;  %v909_v18 = vld [vmem:[#allocation5 + $0x68] ss:$16 sps:$4 sm:$0xff]   ;;  %v912_v19 = vld [vmem:[#allocation5 + $0x8c] ss:$16 sps:$4 sm:$0xff]  }
  0x3f   :  { %486 = vmatprep.subr.bf16.mxu0 %v883_v4  ;;  %526 = vmatpush1.bf16.msra.mxu1 %v897_v10  ;;  %v902_v20 = vld [vmem:[#allocation5 + $0xa0] ss:$16 sps:$4 sm:$0xff]   ;;  %v904_v21 = vld [vmem:[#allocation5 + $0xc4] ss:$16 sps:$4 sm:$0xff]   ;;  %v915_v22 = vld [vmem:[#allocation5 + $0x88] ss:$16 sps:$4 sm:$0xff]  }
  0x40   :  { %527 = vmatprep.subr.bf16.mxu1 %v900_v13  ;;  %v918_v23 = vld [vmem:[#allocation5 + $0xac] ss:$16 sps:$4 sm:$0xff]   ;;  %v908_v24 = vld [vmem:[#allocation5 + $0xc0] ss:$16 sps:$4 sm:$0xff]   ;;  %v910_v25 = vld [vmem:[#allocation5 + $0xe4] ss:$16 sps:$4 sm:$0xff]  }
  0x41   :  { %v921_v26 = vld [vmem:[#allocation5 + $0xa8] ss:$16 sps:$4 sm:$0xff]   ;;  %v924_v27 = vld [vmem:[#allocation5 + $0xcc] ss:$16 sps:$4 sm:$0xff]   ;;  %v914_v28 = vld [vmem:[#allocation5 + $0xe0] ss:$16 sps:$4 sm:$0xff]  }
  0x42   :  { %487 = vmatpush1.bf16.msra.mxu0 %v885_v7  ;;  %v916_v29 = vld [vmem:[#allocation5 + $0x104] ss:$16 sps:$4 sm:$0xff]   ;;  %v927_v30 = vld [vmem:[#allocation5 + $0xc8] ss:$16 sps:$4 sm:$0xff]   ;;  %v930_v31 = vld [vmem:[#allocation5 + $0xec] ss:$16 sps:$4 sm:$0xff]  }
  0x43   :  { %488 = vmatprep.subr.bf16.mxu0 %v886_v8  ;;  %528 = vmatpush1.bf16.msra.mxu1 %v903_v14  ;;  %v920_v32 = vld [vmem:[#allocation5 + $0x100] ss:$16 sps:$4 sm:$0xff]   ;;  %v922_v33 = vld [vmem:[#allocation5 + $0x124] ss:$16 sps:$4 sm:$0xff]   ;;  %v933_v34 = vld [vmem:[#allocation5 + $0xe8] ss:$16 sps:$4 sm:$0xff]  }
  0x44   :  { %529 = vmatprep.subr.bf16.mxu1 %v906_v15  ;;  %v936_v35 = vld [vmem:[#allocation5 + $0x10c] ss:$16 sps:$4 sm:$0xff]   ;;  %v926_v36 = vld [vmem:[#allocation5 + $0x120] ss:$16 sps:$4 sm:$0xff]   ;;  %v928_v37 = vld [vmem:[#allocation5 + $0x144] ss:$16 sps:$4 sm:$0xff]  }
  0x45   :  { %v939_v38 = vld [vmem:[#allocation5 + $0x108] ss:$16 sps:$4 sm:$0xff]   ;;  %v942_v39 = vld [vmem:[#allocation5 + $0x12c] ss:$16 sps:$4 sm:$0xff]   ;;  %v932_v40 = vld [vmem:[#allocation5 + $0x140] ss:$16 sps:$4 sm:$0xff]  }
  0x46   :  { %489 = vmatpush1.bf16.msra.mxu0 %v890_v11  ;;  %v68_v41 = vld [vmem:[%s1281_s0] sm:$0xff]  ;;  %v934_v42 = vld [vmem:[#allocation5 + $0x164] ss:$16 sps:$4 sm:$0xff]   ;;  %v938_v45 = vld [vmem:[#allocation5 + $0x160] ss:$16 sps:$4 sm:$0xff]   ;;  %v1150_v4 = vmov 0.0  }
  0x47   :  { %490 = vmatprep.subr.bf16.mxu0 %v892_v12  ;;  %530 = vmatpush1.bf16.msra.mxu1 %v909_v18  ;;  %v759_v43 = vcombine.high %v68_v41, %v68_v41  ;;  %v945_v44 = vld [vmem:[#allocation5 + $0x128] ss:$16 sps:$4 sm:$0xff]   ;;  %v948_v46 = vld [vmem:[#allocation5 + $0x14c] ss:$16 sps:$4 sm:$0xff]   ;;  %v940_v47 = vld [vmem:[#allocation5 + $0x184] ss:$16 sps:$4 sm:$0xff]   ;;  %v758_v1 = vcombine.low %v68_v41, %v68_v41  ;;  %v135_v12 = vlaneseq }
  0x48   :  { %531 = vmatprep.subr.bf16.mxu1 %v912_v19  ;;  %v951_v48 = vld [vmem:[#allocation5 + $0x148] ss:$16 sps:$4 sm:$0xff]   ;;  %v954_v49 = vld [vmem:[#allocation5 + $0x16c] ss:$16 sps:$4 sm:$0xff]   ;;  %v944_v50 = vld [vmem:[#allocation5 + $0x180] ss:$16 sps:$4 sm:$0xff]  }
  0x49   :  { %514 = vmatprep.mubr.bf16.mxu0 %v759_v43  ;;  %555 = vmatprep.mubr.bf16.mxu1 %v759_v43  ;;  %v946_v51 = vld [vmem:[#allocation5 + $0x1a4] ss:$16 sps:$4 sm:$0xff]   ;;  %v957_v52 = vld [vmem:[#allocation5 + $0x168] ss:$16 sps:$4 sm:$0xff]   ;;  %v960_v53 = vld [vmem:[#allocation5 + $0x18c] ss:$16 sps:$4 sm:$0xff]  }
  0x4a   :  { %491 = vmatpush1.bf16.msra.mxu0 %v896_v16  ;;  %v950_v54 = vld [vmem:[#allocation5 + $0x1a0] ss:$16 sps:$4 sm:$0xff]   ;;  %v952_v55 = vld [vmem:[#allocation5 + $0x1c4] ss:$16 sps:$4 sm:$0xff]   ;;  %v963_v56 = vld [vmem:[#allocation5 + $0x188] ss:$16 sps:$4 sm:$0xff]  }
  0x4b   :  { %492 = vmatprep.subr.bf16.mxu0 %v898_v17  ;;  %532 = vmatpush1.bf16.msra.mxu1 %v915_v22  ;;  %v966_v57 = vld [vmem:[#allocation5 + $0x1ac] ss:$16 sps:$4 sm:$0xff]   ;;  %v956_v58 = vld [vmem:[#allocation5 + $0x1c0] ss:$16 sps:$4 sm:$0xff]   ;;  %v958_v59 = vld [vmem:[#allocation5 + $0x1e4] ss:$16 sps:$4 sm:$0xff]  }
  0x4c   :  { %533 = vmatprep.subr.bf16.mxu1 %v918_v23  ;;  %v968_v60 = vld [vmem:[#allocation5 + $0x1a8] ss:$16 sps:$4 sm:$0xff]   ;;  %v969_v61 = vld [vmem:[#allocation5 + $0x1cc] ss:$16 sps:$4 sm:$0xff]   ;;  %v962_v62 = vld [vmem:[#allocation5 + $0x1e0] ss:$16 sps:$4 sm:$0xff]  }
  0x4d   :  { %v971_v63 = vld [vmem:[#allocation5 + $0x1c8] ss:$16 sps:$4 sm:$0xff]   ;;  %v972_v0 = vld [vmem:[#allocation5 + $0x1ec] ss:$16 sps:$4 sm:$0xff]   ;;  %v975_v3 = vld [vmem:[#allocation7] sm:$0xff]   ;;  %vm1151_vm0 = vmmov 0  }
  0x4e   :  { %493 = vmatpush1.bf16.msra.mxu0 %v902_v20  ;;  %v974_v2 = vld [vmem:[#allocation5 + $0x1e8] ss:$16 sps:$4 sm:$0xff]   ;;  %v977_v6 = vld [vmem:[#allocation7 + $0x10] sm:$0xff]   ;;  %v979_v8 = vld [vmem:[#allocation7 + $0x20] sm:$0xff]   ;;  %v136_v13 = vshrl.u32 %v135_v12, 7  ;;  %s1152_s24 = smov [#allocation9]  }
  0x4f   :  { %494 = vmatprep.subr.bf16.mxu0 %v904_v21  ;;  %534 = vmatpush1.bf16.msra.mxu1 %v921_v26  ;;  %v976_v5 = vld [vmem:[#allocation7 + $0x8] sm:$0xff]   ;;  %v978_v7 = vld [vmem:[#allocation7 + $0x18] sm:$0xff]   ;;  %v981_v10 = vld [vmem:[#allocation7 + $0x30] sm:$0xff]   ;;  %s731_s25 = sshll.u32 %s1152_s24, 4  ;;  %s732_s25 = int_to_ptr.vmem [resolvable:$true] %s731_s25 }
  0x50   :  { %535 = vmatprep.subr.bf16.mxu1 %v924_v27  ;;  %v980_v9 = vld [vmem:[#allocation7 + $0x28] sm:$0xff]   ;;  %v982_v11 = vld [vmem:[#allocation7 + $0x38] sm:$0xff]   ;;  %v137_v14 = vsub.s32 0, %v136_v13  ;;  %v141_v16 = vsub.s32 1, %v136_v13  ;;  %v145_v19 = vsub.s32 2, %v136_v13  ;;  %s1069_s26 = scalar_lea.vmem %s732_s25, 128  ;;  %p1074_p11 = scmp.lt.s32.totalorder %s732_s25, %s732_s25 }
  0x51   :  { %v133_v15 = vld [vmem:[%s1284_s3] sm:$0xf]  ;;  %p1070_p10 = scmp.ne.s32.totalorder %s732_s25, %s1069_s26  ;;  %p1075_p12 = scmp.lt.s32.totalorder %s1069_s26, %s1069_s26 }
  0x52   :  { %495 = vmatpush1.bf16.msra.mxu0 %v908_v24  ;;  %v138_v17 = vrot.slane %v133_v15, %v137_v14  ;;  %v142_v18 = vrot.slane %v133_v15, %v141_v16  ;;  %v146_v27 = vrot.slane %v133_v15, %v145_v19 }
  0x53   :  { %496 = vmatprep.subr.bf16.mxu0 %v910_v25  ;;  %536 = vmatpush1.bf16.msra.mxu1 %v927_v30  ;;  %p1076_p13 = por %p1075_p12, %p1074_p11 }
  0x54   :  { %537 = vmatprep.subr.bf16.mxu1 %v930_v31 }
  0x55   :  { %p1077_p0 = pnand %p1076_p13, %p1070_p10 }
  0x56   :  { %497 = vmatpush1.bf16.msra.mxu0 %v914_v28 }
  0x57   :  { %498 = vmatprep.subr.bf16.mxu0 %v916_v29  ;;  %538 = vmatpush1.bf16.msra.mxu1 %v933_v34  ;;  %v149_v29 = vsub.s32 3, %v136_v13 }
  0x58   :  { %539 = vmatprep.subr.bf16.mxu1 %v936_v35 }
  0x59   :  { %v150_v34 = vrot.slane %v133_v15, %v149_v29 }
  0x5a   :  { %499 = vmatpush1.bf16.msra.mxu0 %v920_v32 }
  0x5b   :  { %500 = vmatprep.subr.bf16.mxu0 %v922_v33  ;;  %540 = vmatpush1.bf16.msra.mxu1 %v939_v38 }
  0x5c   :  { %541 = vmatprep.subr.bf16.mxu1 %v942_v39 }
  0x5e   :  { %501 = vmatpush1.bf16.msra.mxu0 %v926_v36 }
  0x5f   :  { %502 = vmatprep.subr.bf16.mxu0 %v928_v37  ;;  %542 = vmatpush1.bf16.msra.mxu1 %v945_v44  ;;  %v583_v44 = vld [vmem:[#allocation2] sm:$0xff] }
  0x60   :  { %543 = vmatprep.subr.bf16.mxu1 %v948_v46 }
  0x62   :  { %503 = vmatpush1.bf16.msra.mxu0 %v932_v40 }
  0x63   :  { %504 = vmatprep.subr.bf16.mxu0 %v934_v42  ;;  %544 = vmatpush1.bf16.msra.mxu1 %v951_v48 }
  0x64   :  { %545 = vmatprep.subr.bf16.mxu1 %v954_v49 }
  0x66   :  { %505 = vmatpush1.bf16.msra.mxu0 %v938_v45 }
  0x67   :  { %506 = vmatprep.subr.bf16.mxu0 %v940_v47  ;;  %546 = vmatpush1.bf16.msra.mxu1 %v957_v52 }
  0x68   :  { %547 = vmatprep.subr.bf16.mxu1 %v960_v53 }
  0x6a   :  { %507 = vmatpush1.bf16.msra.mxu0 %v944_v50 }
  0x6b   :  { %508 = vmatprep.subr.bf16.mxu0 %v946_v51  ;;  %548 = vmatpush1.bf16.msra.mxu1 %v963_v56 }
  0x6c   :  { %549 = vmatprep.subr.bf16.mxu1 %v966_v57 }
  0x6e   :  { %509 = vmatpush1.bf16.msra.mxu0 %v950_v54 }
  0x6f   :  { %510 = vmatprep.subr.bf16.mxu0 %v952_v55  ;;  %550 = vmatpush1.bf16.msra.mxu1 %v968_v60  ;;  %v827_v55 = vld [vmem:[%s1286_s5] ss:$0 sm:$0xff] }
  0x70   :  { %551 = vmatprep.subr.bf16.mxu1 %v969_v61 }
  0x72   :  { %511 = vmatpush1.bf16.msra.mxu0 %v956_v58 }
  0x73   :  { %512 = vmatprep.subr.bf16.mxu0 %v958_v59  ;;  %552 = vmatpush1.bf16.msra.mxu1 %v971_v63 }
  0x74   :  { %553 = vmatprep.subr.bf16.mxu1 %v972_v0 }
  0x76   :  { %513 = vmatpush1.bf16.msra.mxu0 %v962_v62 }
  0x77   :  { %554 = vmatpush1.bf16.msra.mxu1 %v974_v2  ;;  %845 = vmatprep.subr.bf16.mxu0 %v1150_v4 }
  0x79   :  { %515 = vmatmul.mubr.bf16.vlgmr.msra.gmra.mrb[0].mxu0 %v758_v1 }
  0x7a   :  { %556 = vmatmul.mubr.bf16.vlgmr.msra.gmra.mrb[0].mxu1 %v758_v1  ;;  %846 = vmatpush3.bf16.msra.mxu0 %v975_v3 }
  0x7b   :  { %847 = vmatprep.subr.bf16.mxu0 %v1150_v4  ;;  %861 = vmatprep.mubr.msk.bf16.mxu0 %vm1151_vm0, %v1150_v4 }
  0x7e   :  { %848 = vmatpush3.bf16.msra.mxu0 %v976_v5 }
  0x7f   :  { %849 = vmatprep.subr.bf16.mxu0 %v1150_v4 }
  0x82   :  { %850 = vmatpush3.bf16.msra.mxu0 %v977_v6 }
  0x83   :  { %851 = vmatprep.subr.bf16.mxu0 %v1150_v4 }
  0x86   :  { %852 = vmatpush3.bf16.msra.mxu0 %v978_v7 }
  0x87   :  { %853 = vmatprep.subr.bf16.mxu0 %v1150_v4 }
  0x8a   :  { %854 = vmatpush3.bf16.msra.mxu0 %v979_v8 }
  0x8b   :  { %855 = vmatprep.subr.bf16.mxu0 %v1150_v4 }
  0x8e   :  { %856 = vmatpush3.bf16.msra.mxu0 %v980_v9 }
  0x8f   :  { %857 = vmatprep.subr.bf16.mxu0 %v1150_v4 }
  0x92   :  { %858 = vmatpush3.bf16.msra.mxu0 %v981_v10 }
  0x93   :  { %859 = vmatprep.subr.bf16.mxu0 %v1150_v4 }
  0x96   :  { %860 = vmatpush3.bf16.msra.mxu0 %v982_v11 }
 0x14c   :  { %v516_v20 = vpop.f32.mrb[0].mxu0 }
 0x14d   :  { %v517_v21 = vadd.f32 %v516_v20, %v138_v17  ;;  %v518_v22 = vpop.f32.mrb[1].mxu0  ;;  %v557_v30 = vpop.f32.mrb[0].mxu1 }
 0x14e   :  { %v519_v23 = vadd.f32 %v518_v22, %v142_v18  ;;  %v520_v24 = vpop.f32.mrb[2].mxu0  ;;  %v559_v31 = vpop.f32.mrb[1].mxu1  ;;  %v558_v32 = vadd.f32 %v557_v30, %v146_v27 }
 0x14f   :  { %v824_v25 = vmul.f32 -1.442695, %v517_v21  ;;  %v521_v26 = vpop.f32.mrb[3].mxu0  ;;  %v561_v33 = vpop.f32.mrb[2].mxu1  ;;  %v560_v37 = vadd.f32 %v559_v31, %v150_v34 }
 0x150   :  { %v825_v28 = vmul.f32 -1.442695, %v519_v23  ;;  %v562_v35 = vpop.f32.mrb[3].mxu1  ;;  %v826_v36 = vmul.f32 -1.442695, %v558_v32 }
 0x151   :  { %983 = vpow2.f32 %v824_v25 }
 0x152   :  { %985 = vpow2.f32 %v825_v28 }
 0x153   :  { %987 = vpow2.f32 %v826_v36 }
 0x154   :  { %989 = vtanh.f32 %v560_v37 }
 0x15b   :  { %v984_v38 = vpop.eup %983 }
 0x15c   :  { %v986_v39 = vpop.eup %985  ;;  %v567_v40 = vadd.f32 1.0, %v984_v38 }
 0x15d   :  { %v573_v41 = vadd.f32 1.0, %v986_v39  ;;  %v988_v42 = vpop.eup %987 }
 0x15e   :  { %991 = vrcp.f32 %v567_v40  ;;  %v990_v43 = vpop.eup %989  ;;  %v579_v46 = vadd.f32 1.0, %v988_v42 }
 0x15f   :  { %993 = vrcp.f32 %v573_v41 }
 0x160   :  { %995 = vrcp.f32 %v579_v46 }
 0x168   :  { %v992_v45 = vpop.eup %991 }
 0x169   :  { %v994_v47 = vpop.eup %993  ;;  %v585_v48 = vmul.f32 %v992_v45, %v990_v43 }
 0x16a   :  { %v584_v49 = vmul.f32 %v994_v47, %v583_v44  ;;  %v996_v51 = vpop.eup %995 }
 0x16c   :  { %v586_v50 = vadd.f32 %v585_v48, %v584_v49 }
 0x16e   :  { %997 = vtanh.f32 %v586_v50 }
 0x178   :  { %v998_v52 = vpop.eup %997 }
 0x179   :  { %714 = vst [vmem:[#allocation11] sm:$0xff] %v998_v52  ;;  %v588_v53 = vmul.f32 %v998_v52, %v996_v51 }
 0x17b   :  { %v589_v54 = vpack.c.bf16 %v588_v53, %v588_v53  ;;  %713 = vst [vmem:[#allocation9] sm:$0xff] %v588_v53 }
 0x17d   :  { %862 = vmatmul.mubr.bf16.vlgmr.msra.gmra.mrb[4].mxu0 %v589_v54 }
 0x250   :  { %v695_v56 = vpop.f32.mrb[4].mxu0 }
 0x251   :  { %v696_v57 = vadd.f32 %v827_v55, %v695_v56  ;;  %v863_v58 = vpop.f32.mrb[5].mxu0 }
 0x252   :  { %v698_v59 = vpop.f32.mrb[6].mxu0 }
 0x253   :  { %701 = vmax.xlane.f32.xlu0 %v696_v57  ;;  %v864_v60 = vpop.f32.mrb[7].mxu0 }
 0x2e0   :  { %v702_v61 = vpop.xlane.xlu0 %701 }
 0x2e1   :  { %v703_v62 = vsub.f32 %v696_v57, %v702_v61 }
 0x2e3   :  { %v704_v63 = vmul.f32 1.442695, %v703_v62 }
 0x2e5   :  { %999 = vpow2.f32 %v704_v63 }
 0x2ef   :  { %v1000_v0 = vpop.eup %999 }
 0x2f0   :  { %706 = vadd.xlane.f32.xlu0 %v1000_v0 }
 0x2f1   :  { %1080 = shalt.err (!%p1077_p0)
}
 0x2f2   :  { %s1081_s29 = scalar_lea.hbm %s1288_s7, 128 }
 0x2f3   :  { %p1082_p1 = scmp.ne.s32.totalorder %s1288_s7, %s1081_s29  ;;  %p1085_p2 = scmp.lt.u32.totalorder %s1081_s29, %s1288_s7 }
 0x2f5   :  { %p1087_p3 = pnand %p1085_p2, %p1082_p1 }
 0x2f7   :  { %1090 = shalt.err (!%p1087_p3)
}
 0x2f8   :  { %734 = dma.vmem_to_hbm [thread:$0]  %s732_s25, 128, %s1288_s7, [#allocation10]  }
 0x2f9   :  { %s1153_s12 = smov [#allocation11]  }
 0x2fa   :  { %s741_s13 = sshll.u32 %s1153_s12, 4  ;;  %s742_s13 = int_to_ptr.vmem [resolvable:$true] %s741_s13 }
 0x2fb   :  { %s1091_s14 = scalar_lea.vmem %s742_s13, 128  ;;  %p1096_p5 = scmp.lt.s32.totalorder %s742_s13, %s742_s13 }
 0x2fc   :  { %p1092_p4 = scmp.ne.s32.totalorder %s742_s13, %s1091_s14  ;;  %p1097_p6 = scmp.lt.s32.totalorder %s1091_s14, %s1091_s14 }
 0x2fe   :  { %p1098_p7 = por %p1097_p6, %p1096_p5 }
 0x300   :  { %p1099_p8 = pnand %p1098_p7, %p1092_p4 }
 0x302   :  { %1102 = shalt.err (!%p1099_p8)
}
 0x303   :  { %s1103_s17 = scalar_lea.hbm %s1289_s8, 128 }
 0x304   :  { %p1104_p9 = scmp.ne.s32.totalorder %s1289_s8, %s1103_s17  ;;  %p1107_p10 = scmp.lt.u32.totalorder %s1103_s17, %s1289_s8 }
 0x306   :  { %p1109_p11 = pnand %p1107_p10, %p1104_p9 }
 0x308   :  { %1112 = shalt.err (!%p1109_p11)
}
 0x309   :  { %744 = dma.vmem_to_hbm [thread:$0]  %s742_s13, 128, %s1289_s8, [#allocation10]  }
 0x30a   :  { %s1154_s21 = smov [#allocation8]  }
 0x30b   :  { %s721_s0 = sshll.u32 %s1154_s21, 4  ;;  %s722_s0 = int_to_ptr.vmem [resolvable:$true] %s721_s0 }
 0x30c   :  { %s1113_s22 = scalar_lea.vmem %s722_s0, 128  ;;  %p1118_p13 = scmp.lt.s32.totalorder %s722_s0, %s722_s0 }
 0x30d   :  { %p1114_p12 = scmp.ne.s32.totalorder %s722_s0, %s1113_s22  ;;  %p1119_p0 = scmp.lt.s32.totalorder %s1113_s22, %s1113_s22 }
 0x30f   :  { %p1120_p1 = por %p1119_p0, %p1118_p13 }
 0x311   :  { %p1121_p2 = pnand %p1120_p1, %p1114_p12 }
 0x37d   :  { %v707_v1 = vpop.xlane.xlu0 %706 }
 0x37e   :  { %1001 = vlog2.f32 %v707_v1 }
 0x388   :  { %v1002_v2 = vpop.eup %1001 }
 0x389   :  { %v709_v3 = vmul.f32 0.6931472, %v1002_v2 }
 0x38b   :  { %v710_v4 = vadd.f32 %v709_v3, %v702_v61 }
 0x38d   :  { %v711_v5 = vsub.f32 %v696_v57, %v710_v4 }
 0x38f   :  { %712 = vst [vmem:[#allocation8] sm:$0xff] %v711_v5 }
 0x390   :  { %1124 = shalt.err (!%p1121_p2)
}
 0x391   :  { %s1125_s8 = scalar_lea.hbm %s1287_s6, 128 }
 0x392   :  { %p1126_p3 = scmp.ne.s32.totalorder %s1287_s6, %s1125_s8  ;;  %p1129_p4 = scmp.lt.u32.totalorder %s1125_s8, %s1287_s6 }
 0x394   :  { %p1131_p5 = pnand %p1129_p4, %p1126_p3 }
 0x396   :  { %1134 = shalt.err (!%p1131_p5)
}
 0x397   :  { %724 = dma.vmem_to_hbm [thread:$0]  %s722_s0, 128, %s1287_s6, [#allocation4]  }
 0x398   :  { %1139 = dma.done.wait [#allocation4], 128  }
 0x399   :  { %1140 = vsyncadd [#allocation4], 4294967168 }
 0x39a   :  { %1141 = dma.done.wait [#allocation10], 256  }
 0x39b   :  { %1142 = vsyncadd [#allocation10], 4294967040 }
 0x39c   :  { %754 = vsyncpa [#allocation3], 1 }
 0x39d   :  { %755 = vsyncpa [#allocation6], 1 }
 0x39e   :  { %756 = vsyncpa [#allocation4], 1 }
 0x39f   :  { %757 = vsyncpa [#allocation10], 1 }

</bundles_post_ra>
